<compile_context>
chip_gen: v6e
topology: v6e:2x2x1
jax: 0.10.0
libtpu: 0.0.40
codegen_flags: <defaults>
</compile_context>

<pallas_src>
import functools

import jax
import jax.numpy as jnp
from jax import lax
from jax.experimental import pallas as pl
from jax.experimental.pallas import tpu as pltpu


def _round_up(x, m):
    return (x + m - 1) // m * m


def _pick_block_batch(B, max_bt=8):
    """Largest divisor of B that is <= max_bt while keeping >= 2 grid steps."""
    for bt in range(min(B, max_bt), 0, -1):
        if B % bt == 0 and B // bt >= 2:
            return bt
    return 1


def _convlstm_kernel(x_ref, h_ref, c_ref, w_ref, b_ref,
                     h_out_ref, c_out_ref,
                     xpad_ref, col_ref, acc_ref,
                     *, H, W, K, Cx, hid, Bt, front, L):
    """One grid step processes Bt batch elements.

    x_ref    : (Bt, Cx,  H*W)   f32 input slab
    h_ref    : (Bt, hid, H*W)   f32 previous hidden
    c_ref    : (Bt, hid, H*W)   f32 previous cell
    w_ref    : (4*hid, K*K*Cin) bf16 conv weight, tap-major rows (dy, dx, c)
    b_ref    : (4*hid, 1)       f32 conv bias
    h_out_ref, c_out_ref: (Bt, hid, H*W)
    xpad_ref : (Cin, L)            f32  VMEM scratch, flat zero-padded [x ; h]
    col_ref  : (K*K*Cin, Bt*H*W)   bf16 VMEM scratch, im2col matrix
    acc_ref  : (4*hid, Bt*H*W)     f32  VMEM scratch, gate pre-activations
    """
    HW = H * W
    Cin = Cx + hid
    p = K // 2
    pad_min = p * W + p          # zeros needed on each side of the flat row

    # Zero the padding regions once per grid step (the interior is overwritten
    # per sample below, so the pads stay zero for every sample / step).
    if front > 0:
        xpad_ref[:, 0:front] = jnp.zeros((Cin, front), dtype=xpad_ref.dtype)
    if L > front + HW:
        xpad_ref[:, front + HW:L] = jnp.zeros((Cin, L - front - HW),
                                              dtype=xpad_ref.dtype)

    # Lane-validity masks per horizontal tap offset (dx - p): a tap reading
    # column x + (dx - p) outside [0, W) must be zeroed (the flat layout would
    # otherwise wrap to the neighbouring row).
    col_idx = lax.broadcasted_iota(jnp.int32, (1, HW), 1) % W   # (1, HW)
    lane_ok = []
    for dx in range(K):
        s = dx - p
        if s < 0:
            lane_ok.append(col_idx >= -s)
        elif s > 0:
            lane_ok.append(col_idx < W - s)
        else:
            lane_ok.append(None)

    # Build the im2col matrix (K*K*Cin, Bt*HW).
    for b in range(Bt):
        # In-kernel channel concat + zero padding: write [x ; h] into the
        # interior of the flat padded buffer (lane-aligned store at `front`).
        xpad_ref[0:Cx, front:front + HW] = x_ref[b].astype(xpad_ref.dtype)
        xpad_ref[Cx:Cin, front:front + HW] = h_ref[b].astype(xpad_ref.dtype)
        xp = xpad_ref[...]                                      # (Cin, L) f32

        for dy in range(K):
            for dx in range(K):
                t = dy * K + dx
                start = front - pad_min + dy * W + dx
                patch = xp[:, start:start + HW]                 # (Cin, HW)
                ok = lane_ok[dx]
                if ok is not None:
                    patch = jnp.where(ok, patch, 0.0)
                col_ref[t * Cin:(t + 1) * Cin, b * HW:(b + 1) * HW] = (
                    patch.astype(col_ref.dtype))

    # One deep MXU matmul (contraction K*K*Cin) for all gates of all Bt
    # samples, f32 accumulation; bias broadcast along lanes.
    acc_ref[...] = (
        jnp.dot(w_ref[...], col_ref[...], preferred_element_type=jnp.float32)
        + b_ref[...])

    # Gate nonlinearities + LSTM cell update, lane-dense (hid, HW) blocks.
    # Gate order matches torch.chunk(conv_out, 4, dim=1): i, f, o, g.
    for b in range(Bt):
        lo, hi = b * HW, (b + 1) * HW
        i = jax.nn.sigmoid(acc_ref[0 * hid:1 * hid, lo:hi])
        f = jax.nn.sigmoid(acc_ref[1 * hid:2 * hid, lo:hi])
        o = jax.nn.sigmoid(acc_ref[2 * hid:3 * hid, lo:hi])
        g = jnp.tanh(acc_ref[3 * hid:4 * hid, lo:hi])
        c_prev = c_ref[b].astype(jnp.float32)                   # (hid, HW)
        c = f * c_prev + i * g
        h = o * jnp.tanh(c)
        h_out_ref[b] = h.astype(h_out_ref.dtype)
        c_out_ref[b] = c.astype(c_out_ref.dtype)


def conv_lstm_cell_flat(x, h_prev, c_prev, w_mat, bias_col, *, H, W, K,
                        block_batch=None):
    """x: (B, Cx, H*W); h_prev/c_prev: (B, hid, H*W); w_mat: (4*hid, K*K*Cin)
    tap-major (dy, dx, c), bf16; bias_col: (4*hid, 1) f32."""
    B, Cx, HW = x.shape
    hid = h_prev.shape[1]
    Cin = Cx + hid
    CKK = K * K * Cin
    p = K // 2
    pad_min = p * W + p
    front = _round_up(pad_min, 128)          # lane-aligned interior offset
    L = _round_up(front + HW + pad_min, 128)

    Bt = block_batch if block_batch is not None else _pick_block_batch(B)
    assert B % Bt == 0

    kernel = functools.partial(_convlstm_kernel, H=H, W=W, K=K, Cx=Cx,
                               hid=hid, Bt=Bt, front=front, L=L)

    grid_spec = pltpu.PrefetchScalarGridSpec(
        num_scalar_prefetch=0,
        grid=(B // Bt,),
        in_specs=[
            pl.BlockSpec((Bt, Cx, HW), lambda n: (n, 0, 0)),
            pl.BlockSpec((Bt, hid, HW), lambda n: (n, 0, 0)),
            pl.BlockSpec((Bt, hid, HW), lambda n: (n, 0, 0)),
            pl.BlockSpec((4 * hid, CKK), lambda n: (0, 0)),
            pl.BlockSpec((4 * hid, 1), lambda n: (0, 0)),
        ],
        out_specs=[
            pl.BlockSpec((Bt, hid, HW), lambda n: (n, 0, 0)),
            pl.BlockSpec((Bt, hid, HW), lambda n: (n, 0, 0)),
        ],
        scratch_shapes=[
            pltpu.VMEM((Cin, L), jnp.float32),            # flat padded [x ; h]
            pltpu.VMEM((CKK, Bt * HW), jnp.bfloat16),     # im2col
            pltpu.VMEM((4 * hid, Bt * HW), jnp.float32),  # gate pre-activations
        ],
    )

    out_shape = (
        jax.ShapeDtypeStruct((B, hid, HW), x.dtype),
        jax.ShapeDtypeStruct((B, hid, HW), x.dtype),
    )

    h, c = pl.pallas_call(
        kernel,
        out_shape=out_shape,
        grid_spec=grid_spec,
        compiler_params=pltpu.CompilerParams(
            dimension_semantics=("parallel",),
            vmem_limit_bytes=32 * 1024 * 1024,
        ),
    )(x, h_prev, c_prev, w_mat, bias_col)
    return h, c


def conv_lstm_cell_nchw(x, h_prev, c_prev, weight_oihw, bias, kernel_size,
                        block_batch=None):
    """PyTorch-convention entry point: NCHW in, NCHW out."""
    B, Cx, H, W = x.shape
    hid = h_prev.shape[1]
    Cin = Cx + hid
    K = kernel_size

    # Free reshapes: NCHW -> (B, C, H*W). No HBM transpose passes.
    x_f = x.reshape(B, Cx, H * W)
    h_f = h_prev.reshape(B, hid, H * W)
    c_f = c_prev.reshape(B, hid, H * W)

    # Weight OIHW -> (O, Kh, Kw, I) -> (4*hid, K*K*Cin): row o, column
    # (dy*K + dx)*Cin + c matches the im2col row ordering. bf16 for the MXU.
    w_mat = jnp.transpose(weight_oihw, (0, 2, 3, 1)).reshape(4 * hid, K * K * Cin)
    w_mat = w_mat.astype(jnp.bfloat16)
    bias_col = bias.reshape(4 * hid, 1).astype(jnp.float32)

    h_o, c_o = conv_lstm_cell_flat(x_f, h_f, c_f, w_mat, bias_col,
                                   H=H, W=W, K=K, block_batch=block_batch)
    return h_o.reshape(B, hid, H, W), c_o.reshape(B, hid, H, W)


def _reference_nchw(x, h_prev, c_prev, weight_oihw, bias, kernel_size):
    """Pure-JAX f32 reference matching the PyTorch forward (NCHW)."""
    p = kernel_size // 2
    combined = jnp.concatenate([x, h_prev], axis=1)
    conv_out = lax.conv_general_dilated(
        combined, weight_oihw, window_strides=(1, 1), padding=((p, p), (p, p)),
        dimension_numbers=("NCHW", "OIHW", "NCHW")) + bias[None, :, None, None]
    cc_i, cc_f, cc_o, cc_g = jnp.split(conv_out, 4, axis=1)
    i = jax.nn.sigmoid(cc_i)
    f = jax.nn.sigmoid(cc_f)
    o = jax.nn.sigmoid(cc_o)
    g = jnp.tanh(cc_g)
    c = f * c_prev + i * g
    h = o * jnp.tanh(c)
    return h, c


def _run_case(B, input_dim, hidden_dim, H, W, K):
    cin = input_dim + hidden_dim
    cout = 4 * hidden_dim

    key = jax.random.PRNGKey(0)
    kx, kh, kc, kw, kb = jax.random.split(key, 5)

    x = jax.random.normal(kx, (B, input_dim, H, W), jnp.float32)       # NCHW
    h_prev = jax.random.normal(kh, (B, hidden_dim, H, W), jnp.float32)
    c_prev = jax.random.normal(kc, (B, hidden_dim, H, W), jnp.float32)

    # Deterministic parameter init mimicking nn.Conv2d defaults.
    fan_in = cin * K * K
    bound = 1.0 / (fan_in ** 0.5)
    weight = jax.random.uniform(kw, (cout, cin, K, K), jnp.float32, -bound, bound)
    bias = jax.random.uniform(kb, (cout,), jnp.float32, -bound, bound)

    h_out, c_out = conv_lstm_cell_nchw(x, h_prev, c_prev, weight, bias, K)
    jax.block_until_ready((h_out, c_out))

    h_ref, c_ref = _reference_nchw(x, h_prev, c_prev, weight, bias, K)
    # bf16 MXU inputs -> relaxed tolerance vs. the f32 reference.
    assert jnp.allclose(h_out, h_ref, atol=2e-2, rtol=2e-2), "h mismatch"
    assert jnp.allclose(c_out, c_ref, atol=2e-2, rtol=2e-2), "c mismatch"


if __name__ == "__main__":
    # Small shapes consistent with the module.
    _run_case(B=2, input_dim=4, hidden_dim=32, H=16, W=16, K=3)   # Bt=1, 2 grid steps
    _run_case(B=8, input_dim=4, hidden_dim=32, H=16, W=16, K=3)   # Bt=4, batched-matmul path
    print("KERNEL_OK")
</pallas_src>

<mosaic_0001>
module attributes {stable_mosaic.version = 11 : i64} {
  func.func @_convlstm_kernel(%arg0: i32, %arg1: memref<1x4x256xf32, #tpu.memory_space<vmem>>, %arg2: memref<1x32x256xf32, #tpu.memory_space<vmem>>, %arg3: memref<1x32x256xf32, #tpu.memory_space<vmem>>, %arg4: memref<128x324xbf16, #tpu.memory_space<vmem>>, %arg5: memref<128x1xf32, #tpu.memory_space<vmem>>, %arg6: memref<1x32x256xf32, #tpu.memory_space<vmem>>, %arg7: memref<1x32x256xf32, #tpu.memory_space<vmem>>, %arg8: memref<36x512xf32, #tpu.memory_space<vmem>>, %arg9: memref<324x256xbf16, #tpu.memory_space<vmem>>, %arg10: memref<128x256xf32, #tpu.memory_space<vmem>>) attributes {dimension_semantics = [#tpu.dimension_semantics<parallel>], iteration_bounds = array<i64: 2>, scalar_prefetch = 0 : i64, scratch_operands = 3 : i64, tpu.core_type = #tpu.core_type<tc>, window_params = [{transform_indices = @transform_0, window_bounds = array<i64: 1, 4, 256>}, {transform_indices = @transform_1, window_bounds = array<i64: 1, 32, 256>}, {transform_indices = @transform_2, window_bounds = array<i64: 1, 32, 256>}, {pipeline_mode = #tpu.pipeline_mode<synchronous>, transform_indices = @transform_3, window_bounds = array<i64: 128, 324>}, {pipeline_mode = #tpu.pipeline_mode<synchronous>, transform_indices = @transform_4, window_bounds = array<i64: 128, 1>}, {transform_indices = @transform_5, window_bounds = array<i64: 1, 32, 256>}, {transform_indices = @transform_6, window_bounds = array<i64: 1, 32, 256>}]} {
    %cst = arith.constant 0.000000e+00 : f32
    %0 = vector.broadcast %cst : f32 to vector<36x128xf32>
    %c0 = arith.constant 0 : index
    %c0_0 = arith.constant 0 : index
    %1 = vector.load %arg8[%c0, %c0_0] : memref<36x512xf32, #tpu.memory_space<vmem>>, vector<36x128xf32>
    tpu.vector_store %arg8[%c0, %c0_0], %0 {strides = array<i32>} : memref<36x512xf32, #tpu.memory_space<vmem>>, vector<36x128xf32>,
    %cst_1 = arith.constant 0.000000e+00 : f32
    %2 = vector.broadcast %cst_1 : f32 to vector<36x128xf32>
    %c0_2 = arith.constant 0 : index
    %c384 = arith.constant 384 : index
    %3 = vector.load %arg8[%c0_2, %c384] : memref<36x512xf32, #tpu.memory_space<vmem>>, vector<36x128xf32>
    tpu.vector_store %arg8[%c0_2, %c384], %2 {strides = array<i32>} : memref<36x512xf32, #tpu.memory_space<vmem>>, vector<36x128xf32>,
    %4 = tpu.iota {dimensions = array<i32: 1>} : vector<1x256xi32>
    %c16_i32 = arith.constant 16 : i32
    %c0_i32 = arith.constant 0 : i32
    %5 = arith.cmpi eq, %c16_i32, %c0_i32 : i32
    %c1_i32 = arith.constant 1 : i32
    %6 = arith.select %5, %c1_i32, %c16_i32 : i32
    %7 = vector.broadcast %6 : i32 to vector<1x256xi32>
    %8 = arith.remsi %4, %7 : vector<1x256xi32>
    %c0_i32_3 = arith.constant 0 : i32
    %9 = vector.broadcast %c0_i32_3 : i32 to vector<1x256xi32>
    %10 = arith.cmpi ne, %8, %9 : vector<1x256xi32>
    %c0_i32_4 = arith.constant 0 : i32
    %11 = vector.broadcast %c0_i32_4 : i32 to vector<1x256xi32>
    %12 = arith.cmpi slt, %8, %11 : vector<1x256xi32>
    %c0_i32_5 = arith.constant 0 : i32
    %13 = arith.cmpi slt, %6, %c0_i32_5 : i32
    %14 = vector.broadcast %13 : i1 to vector<1x256xi1>
    %15 = vector.broadcast %14 : vector<1x256xi1> to vector<1x256xi1>
    %16 = arith.xori %12, %15 : vector<1x256xi1>
    %17 = arith.andi %16, %10 : vector<1x256xi1>
    %18 = vector.broadcast %6 : i32 to vector<1x256xi32>
    %19 = arith.addi %8, %18 : vector<1x256xi32>
    %20 = arith.select %17, %19, %8 : vector<1x256xi1>, vector<1x256xi32>
    %c1_i32_6 = arith.constant 1 : i32
    %21 = vector.broadcast %c1_i32_6 : i32 to vector<1x256xi32>
    %22 = arith.cmpi sge, %20, %21 : vector<1x256xi32>
    %c15_i32 = arith.constant 15 : i32
    %23 = vector.broadcast %c15_i32 : i32 to vector<1x256xi32>
    %24 = arith.cmpi slt, %20, %23 : vector<1x256xi32>
    %c0_7 = arith.constant 0 : index
    %c0_8 = arith.constant 0 : index
    %c0_9 = arith.constant 0 : index
    %25 = vector.load %arg1[%c0_7, %c0_8, %c0_9] : memref<1x4x256xf32, #tpu.memory_space<vmem>>, vector<1x4x256xf32>
    %26 = vector.shape_cast %25 : vector<1x4x256xf32> to vector<4x256xf32>
    %c0_10 = arith.constant 0 : index
    %c128 = arith.constant 128 : index
    %27 = vector.load %arg8[%c0_10, %c128] : memref<36x512xf32, #tpu.memory_space<vmem>>, vector<4x256xf32>
    tpu.vector_store %arg8[%c0_10, %c128], %26 {strides = array<i32>} : memref<36x512xf32, #tpu.memory_space<vmem>>, vector<4x256xf32>,
    %c0_11 = arith.constant 0 : index
    %c0_12 = arith.constant 0 : index
    %c0_13 = arith.constant 0 : index
    %28 = vector.load %arg2[%c0_11, %c0_12, %c0_13] : memref<1x32x256xf32, #tpu.memory_space<vmem>>, vector<1x32x256xf32>
    %29 = vector.shape_cast %28 : vector<1x32x256xf32> to vector<32x256xf32>
    %c4 = arith.constant 4 : index
    %c128_14 = arith.constant 128 : index
    %30 = vector.load %arg8[%c4, %c128_14] : memref<36x512xf32, #tpu.memory_space<vmem>>, vector<32x256xf32>
    tpu.vector_store %arg8[%c4, %c128_14], %29 {strides = array<i32>} : memref<36x512xf32, #tpu.memory_space<vmem>>, vector<32x256xf32>,
    %c0_15 = arith.constant 0 : index
    %c0_16 = arith.constant 0 : index
    %31 = vector.load %arg8[%c0_15, %c0_16] : memref<36x512xf32, #tpu.memory_space<vmem>>, vector<36x512xf32>
    %32 = vector.extract_strided_slice %31 {offsets = [0, 111], sizes = [36, 256], strides = [1, 1]} : vector<36x512xf32> to vector<36x256xf32>
    %cst_17 = arith.constant 0.000000e+00 : f32
    %33 = vector.shape_cast %22 : vector<1x256xi1> to vector<1x256xi1>
    %34 = vector.broadcast %33 : vector<1x256xi1> to vector<36x256xi1>
    %35 = vector.broadcast %cst_17 : f32 to vector<36x256xf32>
    %36 = arith.select %34, %32, %35 : vector<36x256xi1>, vector<36x256xf32>
    %37 = arith.truncf %36 : vector<36x256xf32> to vector<36x256xbf16>
    %c0_18 = arith.constant 0 : index
    %c0_19 = arith.constant 0 : index
    %38 = vector.load %arg9[%c0_18, %c0_19] : memref<324x256xbf16, #tpu.memory_space<vmem>>, vector<36x256xbf16>
    tpu.vector_store %arg9[%c0_18, %c0_19], %37 {strides = array<i32>} : memref<324x256xbf16, #tpu.memory_space<vmem>>, vector<36x256xbf16>,
    %39 = vector.extract_strided_slice %31 {offsets = [0, 112], sizes = [36, 256], strides = [1, 1]} : vector<36x512xf32> to vector<36x256xf32>
    %40 = arith.truncf %39 : vector<36x256xf32> to vector<36x256xbf16>
    %c36 = arith.constant 36 : index
    %c0_20 = arith.constant 0 : index
    %41 = vector.load %arg9[%c36, %c0_20] : memref<324x256xbf16, #tpu.memory_space<vmem>>, vector<36x256xbf16>
    tpu.vector_store %arg9[%c36, %c0_20], %40 {strides = array<i32>} : memref<324x256xbf16, #tpu.memory_space<vmem>>, vector<36x256xbf16>,
    %42 = vector.extract_strided_slice %31 {offsets = [0, 113], sizes = [36, 256], strides = [1, 1]} : vector<36x512xf32> to vector<36x256xf32>
    %cst_21 = arith.constant 0.000000e+00 : f32
    %43 = vector.shape_cast %24 : vector<1x256xi1> to vector<1x256xi1>
    %44 = vector.broadcast %43 : vector<1x256xi1> to vector<36x256xi1>
    %45 = vector.broadcast %cst_21 : f32 to vector<36x256xf32>
    %46 = arith.select %44, %42, %45 : vector<36x256xi1>, vector<36x256xf32>
    %47 = arith.truncf %46 : vector<36x256xf32> to vector<36x256xbf16>
    %c72 = arith.constant 72 : index
    %c0_22 = arith.constant 0 : index
    %48 = vector.load %arg9[%c72, %c0_22] : memref<324x256xbf16, #tpu.memory_space<vmem>>, vector<36x256xbf16>
    tpu.vector_store %arg9[%c72, %c0_22], %47 {strides = array<i32>} : memref<324x256xbf16, #tpu.memory_space<vmem>>, vector<36x256xbf16>,
    %49 = vector.extract_strided_slice %31 {offsets = [0, 127], sizes = [36, 256], strides = [1, 1]} : vector<36x512xf32> to vector<36x256xf32>
    %cst_23 = arith.constant 0.000000e+00 : f32
    %50 = vector.shape_cast %22 : vector<1x256xi1> to vector<1x256xi1>
    %51 = vector.broadcast %50 : vector<1x256xi1> to vector<36x256xi1>
    %52 = vector.broadcast %cst_23 : f32 to vector<36x256xf32>
    %53 = arith.select %51, %49, %52 : vector<36x256xi1>, vector<36x256xf32>
    %54 = arith.truncf %53 : vector<36x256xf32> to vector<36x256xbf16>
    %c108 = arith.constant 108 : index
    %c0_24 = arith.constant 0 : index
    %55 = vector.load %arg9[%c108, %c0_24] : memref<324x256xbf16, #tpu.memory_space<vmem>>, vector<36x256xbf16>
    tpu.vector_store %arg9[%c108, %c0_24], %54 {strides = array<i32>} : memref<324x256xbf16, #tpu.memory_space<vmem>>, vector<36x256xbf16>,
    %56 = vector.extract_strided_slice %31 {offsets = [0, 128], sizes = [36, 256], strides = [1, 1]} : vector<36x512xf32> to vector<36x256xf32>
    %57 = arith.truncf %56 : vector<36x256xf32> to vector<36x256xbf16>
    %c144 = arith.constant 144 : index
    %c0_25 = arith.constant 0 : index
    %58 = vector.load %arg9[%c144, %c0_25] : memref<324x256xbf16, #tpu.memory_space<vmem>>, vector<36x256xbf16>
    tpu.vector_store %arg9[%c144, %c0_25], %57 {strides = array<i32>} : memref<324x256xbf16, #tpu.memory_space<vmem>>, vector<36x256xbf16>,
    %59 = vector.extract_strided_slice %31 {offsets = [0, 129], sizes = [36, 256], strides = [1, 1]} : vector<36x512xf32> to vector<36x256xf32>
    %cst_26 = arith.constant 0.000000e+00 : f32
    %60 = vector.shape_cast %24 : vector<1x256xi1> to vector<1x256xi1>
    %61 = vector.broadcast %60 : vector<1x256xi1> to vector<36x256xi1>
    %62 = vector.broadcast %cst_26 : f32 to vector<36x256xf32>
    %63 = arith.select %61, %59, %62 : vector<36x256xi1>, vector<36x256xf32>
    %64 = arith.truncf %63 : vector<36x256xf32> to vector<36x256xbf16>
    %c180 = arith.constant 180 : index
    %c0_27 = arith.constant 0 : index
    %65 = vector.load %arg9[%c180, %c0_27] : memref<324x256xbf16, #tpu.memory_space<vmem>>, vector<36x256xbf16>
    tpu.vector_store %arg9[%c180, %c0_27], %64 {strides = array<i32>} : memref<324x256xbf16, #tpu.memory_space<vmem>>, vector<36x256xbf16>,
    %66 = vector.extract_strided_slice %31 {offsets = [0, 143], sizes = [36, 256], strides = [1, 1]} : vector<36x512xf32> to vector<36x256xf32>
    %cst_28 = arith.constant 0.000000e+00 : f32
    %67 = vector.shape_cast %22 : vector<1x256xi1> to vector<1x256xi1>
    %68 = vector.broadcast %67 : vector<1x256xi1> to vector<36x256xi1>
    %69 = vector.broadcast %cst_28 : f32 to vector<36x256xf32>
    %70 = arith.select %68, %66, %69 : vector<36x256xi1>, vector<36x256xf32>
    %71 = arith.truncf %70 : vector<36x256xf32> to vector<36x256xbf16>
    %c216 = arith.constant 216 : index
    %c0_29 = arith.constant 0 : index
    %72 = vector.load %arg9[%c216, %c0_29] : memref<324x256xbf16, #tpu.memory_space<vmem>>, vector<36x256xbf16>
    tpu.vector_store %arg9[%c216, %c0_29], %71 {strides = array<i32>} : memref<324x256xbf16, #tpu.memory_space<vmem>>, vector<36x256xbf16>,
    %73 = vector.extract_strided_slice %31 {offsets = [0, 144], sizes = [36, 256], strides = [1, 1]} : vector<36x512xf32> to vector<36x256xf32>
    %74 = arith.truncf %73 : vector<36x256xf32> to vector<36x256xbf16>
    %c252 = arith.constant 252 : index
    %c0_30 = arith.constant 0 : index
    %75 = vector.load %arg9[%c252, %c0_30] : memref<324x256xbf16, #tpu.memory_space<vmem>>, vector<36x256xbf16>
    tpu.vector_store %arg9[%c252, %c0_30], %74 {strides = array<i32>} : memref<324x256xbf16, #tpu.memory_space<vmem>>, vector<36x256xbf16>,
    %76 = vector.extract_strided_slice %31 {offsets = [0, 145], sizes = [36, 256], strides = [1, 1]} : vector<36x512xf32> to vector<36x256xf32>
    %cst_31 = arith.constant 0.000000e+00 : f32
    %77 = vector.shape_cast %24 : vector<1x256xi1> to vector<1x256xi1>
    %78 = vector.broadcast %77 : vector<1x256xi1> to vector<36x256xi1>
    %79 = vector.broadcast %cst_31 : f32 to vector<36x256xf32>
    %80 = arith.select %78, %76, %79 : vector<36x256xi1>, vector<36x256xf32>
    %81 = arith.truncf %80 : vector<36x256xf32> to vector<36x256xbf16>
    %c288 = arith.constant 288 : index
    %c0_32 = arith.constant 0 : index
    %82 = vector.load %arg9[%c288, %c0_32] : memref<324x256xbf16, #tpu.memory_space<vmem>>, vector<36x256xbf16>
    tpu.vector_store %arg9[%c288, %c0_32], %81 {strides = array<i32>} : memref<324x256xbf16, #tpu.memory_space<vmem>>, vector<36x256xbf16>,
    %c0_33 = arith.constant 0 : index
    %c0_34 = arith.constant 0 : index
    %83 = vector.load %arg4[%c0_33, %c0_34] : memref<128x324xbf16, #tpu.memory_space<vmem>>, vector<128x324xbf16>
    %c0_35 = arith.constant 0 : index
    %c0_36 = arith.constant 0 : index
    %84 = vector.load %arg9[%c0_35, %c0_36] : memref<324x256xbf16, #tpu.memory_space<vmem>>, vector<324x256xbf16>
    %cst_37 = arith.constant dense<0.000000e+00> : vector<128x256xf32>
    %85 = tpu.matmul %83, %84, %cst_37 {dimension_numbers = #tpu.dot_dimension_numbers<[1], [0], [0], [1], [0, 0, 1, 1], [], []>} : vector<128x324xbf16>, vector<324x256xbf16>, vector<128x256xf32> -> vector<128x256xf32>
    %c0_38 = arith.constant 0 : index
    %c0_39 = arith.constant 0 : index
    %86 = vector.load %arg5[%c0_38, %c0_39] : memref<128x1xf32, #tpu.memory_space<vmem>>, vector<128x1xf32>
    %87 = vector.broadcast %86 : vector<128x1xf32> to vector<128x256xf32>
    %88 = arith.addf %85, %87 : vector<128x256xf32>
    %c0_40 = arith.constant 0 : index
    %c0_41 = arith.constant 0 : index
    %89 = vector.load %arg10[%c0_40, %c0_41] : memref<128x256xf32, #tpu.memory_space<vmem>>, vector<128x256xf32>
    tpu.vector_store %arg10[%c0_40, %c0_41], %88 {strides = array<i32>} : memref<128x256xf32, #tpu.memory_space<vmem>>, vector<128x256xf32>,
    %c0_42 = arith.constant 0 : index
    %c0_43 = arith.constant 0 : index
    %90 = vector.load %arg10[%c0_42, %c0_43] : memref<128x256xf32, #tpu.memory_space<vmem>>, vector<32x256xf32>
    %91 = arith.negf %90 : vector<32x256xf32>
    %92 = math.exp %91 : vector<32x256xf32>
    %cst_44 = arith.constant 1.000000e+00 : f32
    %93 = vector.broadcast %cst_44 : f32 to vector<32x256xf32>
    %94 = arith.addf %93, %92 : vector<32x256xf32>
    %95 = arith.divf %93, %94 : vector<32x256xf32>
    %c32 = arith.constant 32 : index
    %c0_45 = arith.constant 0 : index
    %96 = vector.load %arg10[%c32, %c0_45] : memref<128x256xf32, #tpu.memory_space<vmem>>, vector<32x256xf32>
    %97 = arith.negf %96 : vector<32x256xf32>
    %98 = math.exp %97 : vector<32x256xf32>
    %cst_46 = arith.constant 1.000000e+00 : f32
    %99 = vector.broadcast %cst_46 : f32 to vector<32x256xf32>
    %100 = arith.addf %99, %98 : vector<32x256xf32>
    %101 = arith.divf %99, %100 : vector<32x256xf32>
    %c64 = arith.constant 64 : index
    %c0_47 = arith.constant 0 : index
    %102 = vector.load %arg10[%c64, %c0_47] : memref<128x256xf32, #tpu.memory_space<vmem>>, vector<32x256xf32>
    %103 = arith.negf %102 : vector<32x256xf32>
    %104 = math.exp %103 : vector<32x256xf32>
    %cst_48 = arith.constant 1.000000e+00 : f32
    %105 = vector.broadcast %cst_48 : f32 to vector<32x256xf32>
    %106 = arith.addf %105, %104 : vector<32x256xf32>
    %107 = arith.divf %105, %106 : vector<32x256xf32>
    %c96 = arith.constant 96 : index
    %c0_49 = arith.constant 0 : index
    %108 = vector.load %arg10[%c96, %c0_49] : memref<128x256xf32, #tpu.memory_space<vmem>>, vector<32x256xf32>
    %109 = math.tanh %108 : vector<32x256xf32>
    %c0_50 = arith.constant 0 : index
    %c0_51 = arith.constant 0 : index
    %c0_52 = arith.constant 0 : index
    %110 = vector.load %arg3[%c0_50, %c0_51, %c0_52] : memref<1x32x256xf32, #tpu.memory_space<vmem>>, vector<1x32x256xf32>
    %111 = vector.shape_cast %110 : vector<1x32x256xf32> to vector<32x256xf32>
    %112 = arith.mulf %101, %111 : vector<32x256xf32>
    %113 = arith.mulf %95, %109 : vector<32x256xf32>
    %114 = arith.addf %112, %113 : vector<32x256xf32>
    %115 = math.tanh %114 : vector<32x256xf32>
    %116 = arith.mulf %107, %115 : vector<32x256xf32>
    %c0_53 = arith.constant 0 : index
    %c0_54 = arith.constant 0 : index
    %c0_55 = arith.constant 0 : index
    %117 = vector.load %arg6[%c0_53, %c0_54, %c0_55] : memref<1x32x256xf32, #tpu.memory_space<vmem>>, vector<1x32x256xf32>
    %118 = vector.shape_cast %117 : vector<1x32x256xf32> to vector<32x256xf32>
    %119 = vector.shape_cast %116 : vector<32x256xf32> to vector<1x32x256xf32>
    tpu.vector_store %arg6[%c0_53, %c0_54, %c0_55], %119 {strides = array<i32>} : memref<1x32x256xf32, #tpu.memory_space<vmem>>, vector<1x32x256xf32>,
    %c0_56 = arith.constant 0 : index
    %c0_57 = arith.constant 0 : index
    %c0_58 = arith.constant 0 : index
    %120 = vector.load %arg7[%c0_56, %c0_57, %c0_58] : memref<1x32x256xf32, #tpu.memory_space<vmem>>, vector<1x32x256xf32>
    %121 = vector.shape_cast %120 : vector<1x32x256xf32> to vector<32x256xf32>
    %122 = vector.shape_cast %114 : vector<32x256xf32> to vector<1x32x256xf32>
    tpu.vector_store %arg7[%c0_56, %c0_57, %c0_58], %122 {strides = array<i32>} : memref<1x32x256xf32, #tpu.memory_space<vmem>>, vector<1x32x256xf32>,
    return
  }
  func.func @transform_0(%arg0: i32) -> (i32, i32, i32) {
    %c0_i32 = arith.constant 0 : i32
    %c0_i32_0 = arith.constant 0 : i32
    %c0_i32_1 = arith.constant 0 : i32
    return %arg0, %c0_i32, %c0_i32_0 : i32, i32, i32
  }
  func.func @transform_1(%arg0: i32) -> (i32, i32, i32) {
    %c0_i32 = arith.constant 0 : i32
    %c0_i32_0 = arith.constant 0 : i32
    %c0_i32_1 = arith.constant 0 : i32
    return %arg0, %c0_i32, %c0_i32_0 : i32, i32, i32
  }
  func.func @transform_2(%arg0: i32) -> (i32, i32, i32) {
    %c0_i32 = arith.constant 0 : i32
    %c0_i32_0 = arith.constant 0 : i32
    %c0_i32_1 = arith.constant 0 : i32
    return %arg0, %c0_i32, %c0_i32_0 : i32, i32, i32
  }
  func.func @transform_3(%arg0: i32) -> (i32, i32) {
    %c0_i32 = arith.constant 0 : i32
    %c0_i32_0 = arith.constant 0 : i32
    %c0_i32_1 = arith.constant 0 : i32
    return %c0_i32, %c0_i32_0 : i32, i32
  }
  func.func @transform_4(%arg0: i32) -> (i32, i32) {
    %c0_i32 = arith.constant 0 : i32
    %c0_i32_0 = arith.constant 0 : i32
    %c0_i32_1 = arith.constant 0 : i32
    return %c0_i32, %c0_i32_0 : i32, i32
  }
  func.func @transform_5(%arg0: i32) -> (i32, i32, i32) {
    %c0_i32 = arith.constant 0 : i32
    %c0_i32_0 = arith.constant 0 : i32
    %c0_i32_1 = arith.constant 0 : i32
    return %arg0, %c0_i32, %c0_i32_0 : i32, i32, i32
  }
  func.func @transform_6(%arg0: i32) -> (i32, i32, i32) {
    %c0_i32 = arith.constant 0 : i32
    %c0_i32_0 = arith.constant 0 : i32
    %c0_i32_1 = arith.constant 0 : i32
    return %arg0, %c0_i32, %c0_i32_0 : i32, i32, i32
  }
}

</mosaic_0001>

<bundles_post_ra>
// kernel: tpu_custom_call.1
= control target key start
LH: loop header
LB: loop body
LE: loop exit
PB: predicated region body
PF: predicated region fallthrough
CT: control target
= control target key end

     0   :  { %12 = vsyncpa [#allocation6], 0  ;;  %s4195_s0 = inlined_call_operand.vmem [shape: f32[2,4,256], index: 0, kind: input, shape index: {}]   ;;  %s4196_s1 = inlined_call_operand.vmem [shape: f32[2,32,256], index: 1, kind: input, shape index: {}]   ;;  %s4197_s2 = inlined_call_operand.vmem [shape: f32[2,32,256], index: 2, kind: input, shape index: {}]   ;;  %s4198_s3 = inlined_call_operand.vmem [shape: bf16[128,324], index: 3, kind: input, shape index: {}]   ;;  %s4199_s4 = inlined_call_operand.vmem [shape: f32[128,1], index: 4, kind: input, shape index: {}]   ;;  %s4200_s5 = inlined_call_operand.hbm [shape: f32[2,32,256], index: 5, kind: output, shape index: {0}]   ;;  %s4201_s6 = inlined_call_operand.hbm [shape: f32[2,32,256], index: 6, kind: output, shape index: {1}]  }
   0x1   :  { %14 = vsyncpa [#allocation6 + $0x1], 0 }
   0x2   :  { %15 = vsyncpa [#allocation8], 0 }
   0x3   :  { %17 = vsyncpa [#allocation8 + $0x1], 0  ;;  %s3325_s21 = smov 0   ;;  %s3327_s22 = smov 0  }
   0x4   :  { %s3329_s23 = smov 0   ;;  %s3331_s24 = smov 0  }
   0x5 LB: > { %s3346_s25 = sadd.s32 4294967295, %s3274_s24   ;;  %s2479_s26 = sadd.s32 4294967294, %s3274_s24   ;;  %s3274_s24 = sphi %s3331_s24, %s4227_s24   ;;  %s3270_s23 = sphi %s3329_s23, %s4226_s23   ;;  %s3266_s22 = sphi %s3327_s22, %s4225_s22   ;;  %s3262_s21 = sphi %s3325_s21, %s4224_s21  }
   0x6   : > { %s3350_s27 = sadd.s32 1, %s3274_s24   ;;  %s150_s28 = sadd.s32 1, %s3270_s23 }
   0x7   : > { %s147_s29 = ssub.s32 %s3274_s24, %s3350_s27  ;;  %p160_p0 = scmp.ne.s32.totalorder %s3270_s23, %s3266_s22 }
   0x8   : > { %p148_p1 = scmp.eq.s32.totalorder %s147_s29, 0  ;;  %p161_p2 = scmp.eq.s32.totalorder %s3346_s25, 1 }
   0x9   : > { %p166_p3 = scmp.ne.s32.totalorder %s3266_s22, %s3262_s21  ;;  %p167_p4 = scmp.eq.s32.totalorder %s2479_s26, 1 }
   0xa   : > { %s3361_s30 = scalar_select %p148_p1, %s3270_s23, %s150_s28  }
   0xb   : > { %p3363_p5 = por %p161_p2, %p160_p0  ;;  %p3367_p6 = por %p167_p4, %p166_p3 }
   0xc   : > { %p2482_p7 = scmp.ge.s32.totalorder %s3274_s24, 1  ;;  %p241_p8 = scmp.lt.s32.totalorder %s3274_s24, 3 }
   0xe   : > { %p242_p9 = pnand %p2482_p7, %p241_p8 }
   0xf   : > { %p286_p10 = scmp.lt.s32.totalorder (!%p242_p9), %s3346_s25, 1  ;;  %s3277_s18 = smov (!%p242_p9), 15  }
  0x10   : > { %245 = sbr.rel (%p242_p9) target bundleno = 612 (0x264), region = 40  ;;  %s3278_s19 = smov (!%p242_p9), 1  }
  0x11   : > { %s3279_s20 = smov (!%p242_p9), 16   ;;  %s3280_s26 = smov (!%p242_p9), 17  }
  0x12   : > { %s3281_s28 = smov (!%p242_p9), 113   ;;  %s3283_s29 = smov (!%p242_p9), 112  }
  0x13   : > { %s3285_s12 = smov (!%p242_p9), 111   ;;  %s4202_s13 = sshll.u32 (!%p242_p9), %s3346_s25, 10 }
  0x15   : > { %v3276_v0 = vmov 0.0   ;;  %s3377_s9 = scalar_select %p286_p10, %s3346_s25, 1  ;;  %vm365_vm0 = vcmask 1043456   ;;  %vm580_vm1 = vcmask 1041408   ;;  %vm581_vm2 = vcmask 1045508  }
  0x16   : > { %306 = vst [vmem:[#allocation2 + $0x38] sm:$0xf] %v3276_v0  ;;  %311 = vst [vmem:[#allocation2 + $0x70] sm:$0xf] %v3276_v0  ;;  %vm793_vm4 = vcmask 7168   ;;  %vm695_vm5 = vcmask 121856  }
  0x17   : > { %s2649_s10 = sshll.u32 %s3377_s9, 6  ;;  %s2648_s11 = sshll.u32 %s3377_s9, 3  ;;  %vm3506_vm3 = vmor %vm580_vm1, %vm581_vm2  ;;  %vm641_vm10 = vcmask 130048   ;;  %vm469_vm13 = vcmask 138240   ;;  %vm1035_vm14 = vcmask 924672  }
  0x18   : > { %s295_s14 = scalar_lea.vmem %s4196_s1, %s2649_s10  ;;  %s290_s17 = scalar_lea.vmem %s4195_s0, %s2648_s11 }
  0x19   : > { %v355_v1 = vld [vmem:[%s295_s14 + $0x30] sm:$0xff]  ;;  %v356_v2 = vld [vmem:[%s295_s14 + $0x38] sm:$0xff]  ;;  %v343_v3 = vld [vmem:[%s290_s17] sm:$0xff]  ;;  %s3284_s11 = smov 127   ;;  %s4112_s17 = scalar_lea.hbm %s4201_s6, %s4202_s13 }
  0x1a   : > { %v376_v4 = vrot.slane %v355_v1, 4  ;;  %v378_v5 = vrot.slane %v356_v2, 4  ;;  %347 = vst [vmem:[#allocation2 + $0x18] sm:$0xf] %v343_v3  ;;  %v349_v6 = vld [vmem:[%s295_s14] sm:$0xff]  ;;  %v345_v7 = vcombine.high %v343_v3, %v343_v3  ;;  %v350_v8 = vld [vmem:[%s295_s14 + $0x8] sm:$0xff] }
  0x1b   : > { %v351_v9 = vld [vmem:[%s295_s14 + $0x10] sm:$0xff]  ;;  %v366_v10 = vrot.slane %v349_v6, 4  ;;  %v352_v11 = vld [vmem:[%s295_s14 + $0x18] sm:$0xff]  ;;  %v367_v12 = vrot.slane %v350_v8, 4  ;;  %v353_v14 = vld [vmem:[%s295_s14 + $0x20] sm:$0xff] }
  0x1c   : > { %v368_v13 = vrot.slane %v351_v9, 4  ;;  %v354_v15 = vld [vmem:[%s295_s14 + $0x28] sm:$0xff]  ;;  %398 = vst [vmem:[#allocation2 + $0x48] sm:$0xf] %v376_v4  ;;  %399 = vst [vmem:[#allocation2 + $0x88] sm:$0xf] %v378_v5 }
  0x1d   : > { %348 = vst [vmem:[#allocation2 + $0x78] sm:$0xf] %v345_v7  ;;  %v370_v16 = vrot.slane %v352_v11, 4  ;;  %v372_v17 = vrot.slane %v353_v14, 4  ;;  %v374_v18 = vrot.slane %v354_v15, 4 }
  0x1e   : > { %390 = vst [vmem:[#allocation2 + $0x18] sm:$0xf0] %v366_v10  ;;  %v369_v19 = vsel %vm365_vm0, %v366_v10, %v368_v13  ;;  %391 = vst [vmem:[#allocation2 + $0x78] sm:$0xf0] %v367_v12  ;;  %v3441_v35 = vld [vmem:[#allocation2 + $0x38] sm:$0xf] }
  0x1f   : > { %v3391_v20 = vsel %vm365_vm0, %v367_v12, %v370_v16  ;;  %v3394_v21 = vsel %vm365_vm0, %v368_v13, %v372_v17  ;;  %v3397_v22 = vsel %vm365_vm0, %v370_v16, %v374_v18  ;;  %v377_v23 = vsel %vm365_vm0, %v372_v17, %v376_v4 }
  0x20   : > { %v3401_v24 = vsel %vm365_vm0, %v374_v18, %v378_v5  ;;  %v3425_v32 = vpack.i.bf16 %v3391_v20, %v369_v19  ;;  %v3437_v34 = vpack.i.bf16 %v3394_v21, %v3276_v0  ;;  %v3454_v38 = vpack.i.bf16 %v377_v23, %v3276_v0 }
  0x21   : > { %v3404_v25 = vpack.i.bf16 %v3401_v24, %v377_v23  ;;  %v3461_v39 = vpack.i.bf16 %v3441_v35, %v3401_v24  ;;  %v2662_v40 = vpack.c.bf16 %v377_v23, %v3276_v0  ;;  %v3466_v41 = vpack.c.bf16 %v3397_v22, %v3394_v21 }
  0x22   : > { %v3469_v42 = vpack.c.bf16 %v3401_v24, %v377_v23  ;;  %v2663_v43 = vpack.c.bf16 %v3401_v24, %v3401_v24  ;;  %v2798_v45 = vpack.i.bf16 %v3276_v0, %v3391_v20  ;;  %v3485_v46 = vpack.c.bf16 %v3391_v20, %v369_v19 }
  0x23   : > { %v3406_v26 = vld [vmem:[#allocation2 + $0x48] sm:$0xf]  ;;  %886 = vst [vmem:[#allocation3 + $0x68] sm:$0xff] %v3466_v41  ;;  %v3490_v47 = vpack.i.bf16 %v369_v19, %v3276_v0  ;;  %v598_v49 = vrot.slane %v2662_v40, 6  ;;  %v2658_v50 = vpack.c.bf16 %v369_v19, %v3276_v0  ;;  %v2803_v53 = vpack.i.bf16 %v3397_v22, %v3394_v21  ;;  %v419_v40 = vld [vmem:[#allocation2 + $0x70] sm:$0xf] }
  0x24   : > { %v3408_v27 = vld [vmem:[#allocation2 + $0x88] sm:$0xf]  ;;  %887 = vst [vmem:[#allocation3 + $0x50] sm:$0xff] %v3469_v42  ;;  %v2664_v48 = vpack.c.bf16 %v3406_v26, %v3441_v35  ;;  %v601_v52 = vrot.slane %v2663_v43, 6  ;;  %885 = vst [vmem:[#allocation3 + $0x30] sm:$0xff] %v3485_v46  ;;  %v2660_v56 = vpack.c.bf16 %v3394_v21, %v3276_v0  ;;  %v2659_v61 = vpack.c.bf16 %v3391_v20, %v3391_v20 }
  0x25   : > { %v3412_v28 = vpack.i.bf16 %v3408_v27, %v3406_v26  ;;  %v3414_v29 = vld [vmem:[#allocation2 + $0x18] sm:$0xff]  ;;  %v3475_v44 = vpack.c.bf16 %v3408_v27, %v3406_v26  ;;  %v2665_v51 = vpack.c.bf16 %v3408_v27, %v3408_v27  ;;  %v603_v54 = vrot.slane %v598_v49, 4 }
  0x26   : > { %v3416_v30 = vld [vmem:[#allocation2 + $0x78] sm:$0xff]  ;;  %v3420_v31 = vpack.i.bf16 %v3414_v29, %v3276_v0  ;;  %v604_v55 = vrot.slane %v2664_v48, 6  ;;  %v586_v57 = vrot.slane %v2658_v50, 6  ;;  %v606_v59 = vrot.slane %v601_v52, 4 }
  0x27   : > { %2769 = vrot.lane.b32.xlu1 %v3412_v28, %s3277_s18  ;;  %v3431_v33 = vpack.i.bf16 %v3276_v0, %v3416_v30  ;;  %v3445_v36 = vpack.c.bf16 %v3416_v30, %v3414_v29  ;;  %v3449_v37 = vpack.i.bf16 %v3416_v30, %v3414_v29  ;;  %888 = vst [vmem:[#allocation3 + $0x80] sm:$0x33] %v3475_v44  ;;  %v607_v60 = vrot.slane %v2665_v51, 6 }
  0x28   : > { %2759 = vrot.lane.b32.xlu0 %v3420_v31, %s3278_s19  ;;  %v605_v62 = vsel %vm3506_vm3, %v603_v54, %v604_v55  ;;  %v591_v63 = vrot.slane %v586_v57, 4  ;;  %v592_v1 = vrot.slane %v2660_v56, 6  ;;  %v2661_v3 = vpack.c.bf16 %v3397_v22, %v3397_v22 }
  0x29   : > { %884 = vst [vmem:[#allocation3 + $0x138] sm:$0xff] %v3445_v36  ;;  %v608_v2 = vsel %vm3506_vm3, %v606_v59, %v607_v60  ;;  %v589_v4 = vrot.slane %v2659_v61, 6  ;;  %v2656_v10 = vpack.c.bf16 %v3414_v29, %v3276_v0  ;;  %v2813_v13 = vpack.i.bf16 %v3406_v26, %v3441_v35 }
  0x2a   : > { %v593_v5 = vsel %vm3506_vm3, %v591_v63, %v592_v1  ;;  %v597_v6 = vrot.slane %v592_v1, 4  ;;  %v595_v8 = vrot.slane %v2661_v3, 6  ;;  %v2657_v16 = vpack.c.bf16 %v3416_v30, %v3416_v30 }
  0x2b   : > { %2774 = vrot.lane.b32.xlu1 %v3425_v32, %s3278_s19  ;;  %v594_v7 = vrot.slane %v589_v4, 4  ;;  %v583_v14 = vrot.slane %v2656_v10, 6  ;;  %v2818_v18 = vpack.i.bf16 %v3276_v0, %v3408_v27  ;;  %v2833_v35 = vpack.i.bf16 %v3276_v0, %v3401_v24 }
  0x2c   : > { %2764 = vrot.lane.b32.xlu0 %v3431_v33, %s3278_s19  ;;  %v599_v9 = vsel %vm3506_vm3, %v597_v6, %v598_v49  ;;  %v600_v12 = vrot.slane %v595_v8, 4  ;;  %v584_v19 = vrot.slane %v2657_v16, 6  ;;  %v2858_v43 = vpack.i.bf16 %v419_v40, %v3408_v27  ;;  %v2975_v6 = vld [vmem:[%s4198_s3 + $0x4] ss:$12 sps:$4 sm:$0xff]  }
  0x2d   : > { %v596_v11 = vsel %vm3506_vm3, %v594_v7, %v595_v8  ;;  %v585_v17 = vrot.slane %v583_v14, 4  ;;  %v2853_v24 = vpack.i.bf16 %v3406_v26, %v3276_v0  ;;  %v312_v26 = vlaneseq  ;;  %1852 = vmatprep.mubr.bf16.mxu0 %v2975_v6 }
  0x2e   : > { %v602_v15 = vsel %vm3506_vm3, %v600_v12, %v601_v52  ;;  %v588_v29 = vrot.slane %v584_v19, 4 }
  0x2f   : > { %2779 = vrot.lane.b32.xlu1 %v3437_v34, %s3278_s19  ;;  %v587_v23 = vsel %vm3506_vm3, %v585_v17, %v586_v57  ;;  %v313_v27 = vand.u32 127, %v312_v26 }
  0x30   : > { %779 = vrot.lane.b32.xlu0 %v3397_v22, %s3278_s19 }
  0x31   : > { %v319_v49 = vand.u32 15, %v313_v27 }
  0x33   : > { %2784 = vrot.lane.b32.xlu1 %v3454_v38, %s3277_s18  ;;  %vm3606_vm6 = vcmp.ge.s32.totalorder %v319_v49, 1  ;;  %vm3624_vm9 = vcmp.lt.s32.totalorder %v319_v49, 15 }
  0x34   : > { %2789 = vrot.lane.b32.xlu0 %v3461_v39, %s3277_s18  ;;  %vm3717_vm12 = vmpackc.low %vm3624_vm9, %vm3624_vm9 }
  0x35   : > { %vm3758_vm2 = vmpackc.low %vm3606_vm6, %vm3606_vm6 }
  0x37   : > { %2799 = vrot.lane.b32.xlu1 %v2798_v45, %s3277_s18  ;;  %v3282_v45 = vmov 0.0|0.0  }
  0x38   : > { %2794 = vrot.lane.b32.xlu0 %v3490_v47, %s3277_s18  ;;  %v3563_v48 = vrot.slane %v3282_v45, 6 }
  0x3b   : > { %2809 = vrot.lane.b32.xlu1 %v3420_v31, %s3277_s18 }
  0x3c   : > { %2804 = vrot.lane.b32.xlu0 %v2803_v53, %s3277_s18 }
  0x3f   : > { %625 = vrot.lane.b32.xlu1 %v605_v62, %s3279_s20 }
  0x40   : > { %627 = vrot.lane.b32.xlu0 %v608_v2, %s3279_s20 }
  0x43   : > { %617 = vrot.lane.b32.xlu1 %v593_v5, %s3279_s20 }
  0x44   : > { %669 = vrot.lane.b32.xlu0 %v3416_v30, %s3277_s18  ;;  %v590_v30 = vsel %vm3506_vm3, %v588_v29, %v589_v4 }
  0x47   : > { %621 = vrot.lane.b32.xlu1 %v599_v9, %s3279_s20 }
  0x48   : > { %619 = vrot.lane.b32.xlu0 %v596_v11, %s3279_s20 }
  0x4b   : > { %2814 = vrot.lane.b32.xlu1 %v2813_v13, %s3280_s26 }
  0x4c   : > { %623 = vrot.lane.b32.xlu0 %v602_v15, %s3279_s20 }
  0x4f   : > { %609 = vrot.lane.b32.xlu1 %v583_v14, %s3279_s20 }
  0x50   : > { %2819 = vrot.lane.b32.xlu0 %v2818_v18, %s3280_s26 }
  0x53   : > { %613 = vrot.lane.b32.xlu1 %v587_v23, %s3279_s20 }
  0x54   : > { %611 = vrot.lane.b32.xlu0 %v584_v19, %s3279_s20 }
  0x57   : > { %2824 = vrot.lane.b32.xlu1 %v2803_v53, %s3280_s26 }
  0x58   : > { %615 = vrot.lane.b32.xlu0 %v590_v30, %s3279_s20 }
  0x5b   : > { %2834 = vrot.lane.b32.xlu1 %v2833_v35, %s3280_s26 }
  0x5c   : > { %2829 = vrot.lane.b32.xlu0 %v3454_v38, %s3280_s26 }
  0x5f   : > { %2844 = vrot.lane.b32.xlu1 %v3490_v47, %s3280_s26  ;;  %v1119_v47 = vrot.slane %v3445_v36, 6  ;;  %v314_v36 = vadd.s32 128, %v313_v27 }
  0x60   : > { %2839 = vrot.lane.b32.xlu0 %v3449_v37, %s3280_s26 }
  0x61   : > { %v326_v50 = vand.u32 15, %v314_v36  ;;  %v1121_v61 = vrot.slane %v1119_v47, 4 }
  0x63   : > { %2849 = vrot.lane.b32.xlu1 %v3404_v25, %s3281_s28  ;;  %vm3610_vm7 = vcmp.ge.s32.totalorder %v326_v50, 1  ;;  %vm3618_vm8 = vcmp.lt.s32.totalorder %v326_v50, 15 }
  0x64   : > { %449 = vrot.lane.b32.xlu0 %v3391_v20, %s3280_s26  ;;  %v2883_v20 = vpack.i.bf16 %v3276_v0, %v3397_v22  ;;  %v2923_v22 = vpack.i.bf16 %v3394_v21, %v419_v40  ;;  %v1124_v21 = vrot.slane %v3563_v48, 4  ;;  %vm3708_vm11 = vmpackc.low %vm3618_vm8, %vm3618_vm8  ;;  %s3287_s26 = smov [#allocation7]  }
  0x65   : > { %vm3748_vm15 = vmpackc.low %vm3610_vm7, %vm3610_vm7 }
  0x67   : > { %2859 = vrot.lane.b32.xlu1 %v2858_v43, %s3281_s28 }
  0x68   : > { %2854 = vrot.lane.b32.xlu0 %v2853_v24, %s3281_s28 }
  0x6b   : > { %1147 = vrot.lane.b32.xlu1 %v3563_v48, %s3283_s29 }
  0x6c   : > { %1145 = vrot.lane.b32.xlu0 %v1119_v47, %s3283_s29 }
  0x6f   : > { %2869 = vrot.lane.b32.xlu1 %v2853_v24, %s3284_s11 }
  0x70   : > { %2864 = vrot.lane.b32.xlu0 %v3404_v25, %s3284_s11 }
  0x73   : > { %2879 = vrot.lane.b32.xlu1 %v3437_v34, %s3281_s28 }
  0x74   : > { %2874 = vrot.lane.b32.xlu0 %v3425_v32, %s3281_s28 }
  0x77   : > { %2889 = vrot.lane.b32.xlu1 %v2858_v43, %s3284_s11 }
  0x78   : > { %2884 = vrot.lane.b32.xlu0 %v2883_v20, %s3281_s28 }
  0x7b   : > { %2899 = vrot.lane.b32.xlu1 %v3437_v34, %s3284_s11  ;;  %v1128_v34 = vrot.slane %v3466_v41, 6 }
  0x7c   : > { %2894 = vrot.lane.b32.xlu0 %v3425_v32, %s3284_s11 }
  0x7f   : > { %2909 = vrot.lane.b32.xlu1 %v3449_v37, %s3281_s28 }
  0x80   : > { %2904 = vrot.lane.b32.xlu0 %v2883_v20, %s3284_s11 }
  0x83   : > { %2914 = vrot.lane.b32.xlu1 %v3449_v37, %s3284_s11  ;;  %v2695_v37 = vpack.c.bf16 %v419_v40, %v419_v40 }
  0x84   : > { %1009 = vrot.lane.b32.xlu0 %v3276_v0, %s3281_s28  ;;  %s3188_s28 = sshll.u32 %s3287_s26, 4  ;;  %s3189_s28 = int_to_ptr.vmem [resolvable:$false] %s3188_s28 }
  0x87   : > { %2919 = vrot.lane.b32.xlu1 %v3412_v28, %s3285_s12 }
  0x88   : > { %898 = vrot.lane.b32.xlu0 %v3276_v0, %s3284_s11  ;;  %s4072_s11 = scalar_lea.vmem %s4197_s2, %s2649_s10 }
  0x8b   : > { %2929 = vrot.lane.b32.xlu1 %v2883_v20, %s3285_s12 }
  0x8c   : > { %2924 = vrot.lane.b32.xlu0 %v2923_v22, %s3285_s12 }
  0x8f   : > { %2939 = vrot.lane.b32.xlu1 %v3420_v31, %s3285_s12 }
  0x90   : > { %2934 = vrot.lane.b32.xlu0 %v3404_v25, %s3285_s12  ;;  %v1133_v25 = vrot.slane %v1128_v34, 4 }
  0x93   : > { %2949 = vrot.lane.b32.xlu1 %v3425_v32, %s3285_s12  ;;  %v1134_v32 = vrot.slane %v3469_v42, 6  ;;  %v1140_v42 = vrot.slane %v3475_v44, 6  ;;  %v1122_v44 = vrot.slane %v3485_v46, 6 }
  0x94   : > { %2944 = vrot.lane.b32.xlu0 %v3431_v33, %s3285_s12 }
  0x95   : > { %v1139_v53 = vrot.slane %v1134_v32, 4  ;;  %v1127_v5 = vrot.slane %v1122_v44, 4  ;;  %v1123_v35 = vsel %vm3506_vm3, %v1121_v61, %v1122_v44 }
  0x97   : > { %2954 = vrot.lane.b32.xlu1 %v3454_v38, %s3278_s19  ;;  %v1143_v38 = vrot.slane %v2695_v37, 6  ;;  %v1141_v4 = vsel %vm3506_vm3, %v1139_v53, %v1140_v42  ;;  %v1129_v27 = vsel %vm3506_vm3, %v1127_v5, %v1128_v34 }
  0x98   : > { %1206 = vrot.lane.b32.xlu0 %v3276_v0, %s3285_s12  ;;  %v3603_v0 = vsel %vm3506_vm3, %v1124_v21, %v3563_v48  ;;  %s4076_s12 = sand.u32 1, %s3266_s22  }
  0x99   : > { %v3591_v31 = vpop.permute.xlu1 %2769  ;;  %v1144_v46 = vsel %vm3506_vm3, %v1124_v21, %v1143_v38  ;;  %s2483_s9 = sshll.u32 %s4076_s12, 6  ;;  %s2332_s18 = scalar_lea.sflag [#allocation8], %s4076_s12 }
  0x9a   : > { %v2760_v33 = vpop.permute.xlu0 %2759  ;;  %v2772_v17 = vunpack.i.h.bf16 %v3591_v31  ;;  %v2771_v18 = vunpack.i.l.bf16 %v3591_v31  ;;  %s4087_s10 = scalar_lea.vmem [#allocation7], %s2483_s9 }
  0x9b   : > { %v2762_v51 = vunpack.i.h.bf16 %v2760_v33  ;;  %v2761_v52 = vunpack.i.l.bf16 %v2760_v33  ;;  %2964 = vrot.lane.b32.xlu1 %v3412_v28, %s3278_s19  ;;  %s2361_s14 = sshll.u32 %s4087_s10, 4  ;;  %s4114_s14 = int_to_ptr.vmem [resolvable:$true] %s2361_s14 }
  0x9c   : > { %2959 = vrot.lane.b32.xlu0 %v3461_v39, %s3278_s19  ;;  %v1135_v39 = vsel %vm3506_vm3, %v1133_v25, %v1134_v32  ;;  %v705_v36 = vsel %vm695_vm5, %v2771_v18, %v2772_v17  ;;  %s3184_s19 = scalar_lea.vmem %s4114_s14, 1024  ;;  %p3191_p0 = scmp.lt.s32.totalorder %s4114_s14, %s3189_s28 }
  0x9d   : > { %v2775_v28 = vpop.permute.xlu1 %2774  ;;  %v794_v56 = vsel %vm793_vm4, %v2761_v52, %v2762_v51  ;;  %v3286_v52 = vmov 0   ;;  %v725_v38 = vsel %vm3618_vm8, %v705_v36, 0.0  ;;  %p3185_p11 = scmp.ne.s32.totalorder %s4114_s14, %s3184_s19 }
  0x9e   : > { %v2777_v57 = vunpack.i.h.bf16 %v2775_v28  ;;  %v2776_v59 = vunpack.i.l.bf16 %v2775_v28  ;;  %v2765_v60 = vpop.permute.xlu0 %2764  ;;  %v814_v7 = vsel %vm3606_vm6, %v794_v56, 0.0  ;;  %1965 = vmatprep.mubr.bf16.mxu1 %v3286_v52  ;;  %2969 = vset.pattern.permute.xlu1 %v3286_v52 }
  0x9f   : > { %v2767_v63 = vunpack.i.h.bf16 %v2765_v60  ;;  %v2766_v1 = vunpack.i.l.bf16 %v2765_v60  ;;  %1159 = vrot.lane.b32.xlu1 %v3603_v0, %s3283_s29  ;;  %2968 = vset.pattern.permute.xlu0 %v3286_v52  ;;  %p3186_p12 = pnand %p3185_p11, %p3363_p5 }
  0xa0   : > { %v797_v3 = vsel %vm793_vm4, %v2776_v59, %v2777_v57  ;;  %1157 = vrot.lane.b32.xlu0 %v1135_v39, %s3283_s29 }
  0xa1   : > { %v817_v8 = vsel %vm3610_vm7, %v797_v3, 0.0  ;;  %v796_v9 = vsel %vm793_vm4, %v2767_v63, %v2776_v59  ;;  %v795_v10 = vsel %vm793_vm4, %v2762_v51, %v2766_v1  ;;  %v2780_v11 = vpop.permute.xlu1 %2779  ;;  %p3187_p13 = pneg %p3186_p12 }
  0xa2   : > { %v816_v12 = vsel %vm3606_vm6, %v796_v9, 0.0  ;;  %v815_v13 = vsel %vm3610_vm7, %v795_v10, 0.0  ;;  %v2782_v14 = vunpack.i.h.bf16 %v2780_v11  ;;  %v2781_v15 = vunpack.i.l.bf16 %v2780_v11  ;;  %v780_v16 = vpop.permute.xlu0 %779 }
  0xa3   : > { %v2672_v19 = vpack.c.bf16 %v817_v8, %v816_v12  ;;  %v2671_v23 = vpack.c.bf16 %v815_v13, %v814_v7  ;;  %1163 = vrot.lane.b32.xlu1 %v1144_v46, %s3283_s29 }
  0xa4   : > { %v798_v29 = vsel %vm793_vm4, %v2781_v15, %v2782_v14  ;;  %v799_v30 = vsel %vm793_vm4, %v2782_v14, %v780_v16  ;;  %1161 = vrot.lane.b32.xlu0 %v1141_v4, %s3283_s29 }
  0xa5   : > { %v853_v40 = vrot.slane %v2672_v19, 6  ;;  %v851_v43 = vrot.slane %v2671_v23, 6  ;;  %v818_v24 = vsel %vm3606_vm6, %v798_v29, 0.0  ;;  %v819_v45 = vsel %vm3610_vm7, %v799_v30, 0.0  ;;  %v2785_v48 = vpop.permute.xlu1 %2784 }
  0xa6   : > { %v3659_v47 = vpack.c.bf16 %v819_v45, %v818_v24  ;;  %v2787_v20 = vunpack.i.h.bf16 %v2785_v48  ;;  %v2786_v22 = vunpack.i.l.bf16 %v2785_v48  ;;  %v2790_v26 = vpop.permute.xlu0 %2789 }
  0xa7   : > { %v852_v21 = vrot.slane %v851_v43, 4  ;;  %869 = vst [vmem:[#allocation3 + $0xc8] sm:$0xcc] %v851_v43  ;;  %v2792_v37 = vunpack.i.h.bf16 %v2790_v26  ;;  %v2791_v31 = vunpack.i.l.bf16 %v2790_v26  ;;  %1151 = vrot.lane.b32.xlu1 %v3603_v0, %s3283_s29  ;;  %v855_v49 = vrot.slane %v853_v40, 4 }
  0xa8   : > { %v856_v25 = vrot.slane %v3659_v47, 6  ;;  %v702_v32 = vsel %vm695_vm5, %v2786_v22, %v2787_v20  ;;  %1149 = vrot.lane.b32.xlu0 %v1123_v35, %s3283_s29 }
  0xa9   : > { %v854_v41 = vsel %vm3506_vm3, %v852_v21, %v853_v40  ;;  %v722_v34 = vsel %vm3624_vm9, %v702_v32, 0.0  ;;  %v704_v33 = vsel %vm695_vm5, %v2792_v37, %v2771_v18  ;;  %v703_v50 = vsel %vm695_vm5, %v2787_v20, %v2791_v31  ;;  %v2800_v51 = vpop.permute.xlu1 %2799  ;;  %v2973_v21 = vld [vmem:[%s4198_s3] ss:$12 sps:$4 sm:$0xff]  }
  0xaa   : > { %v857_v53 = vsel %vm3506_vm3, %v855_v49, %v856_v25  ;;  %v724_v42 = vsel %vm3624_vm9, %v704_v33, 0.0  ;;  %v723_v28 = vsel %vm3618_vm8, %v703_v50, 0.0  ;;  %v2795_v39 = vpop.permute.xlu0 %2794  ;;  %v2801_v59 = vunpack.i.l.bf16 %v2800_v51 }
  0xab   : > { %v2670_v56 = vpack.c.bf16 %v725_v38, %v724_v42  ;;  %v2669_v57 = vpack.c.bf16 %v723_v28, %v722_v34  ;;  %1155 = vrot.lane.b32.xlu1 %v3603_v0, %s3283_s29  ;;  %v2797_v60 = vunpack.i.h.bf16 %v2795_v39  ;;  %v2796_v44 = vunpack.i.l.bf16 %v2795_v39 }
  0xac   : > { %1153 = vrot.lane.b32.xlu0 %v1129_v27, %s3283_s29  ;;  %v2580_v61 = vcombine.high %v854_v41, %v857_v53  ;;  %v2579_v63 = vcombine.low %v854_v41, %v857_v53  ;;  %v2802_v3 = vunpack.i.h.bf16 %v2800_v51  ;;  %s3190_s29 = scalar_lea.vmem %s3189_s28, 2048 }
  0xad   : > { %762 = vst [vmem:[#allocation3 + $0xc8] sm:$0x33] %v2670_v56  ;;  %v2810_v1 = vpop.permute.xlu1 %2809  ;;  %v699_v46 = vsel %vm695_vm5, %v2797_v60, %v2801_v59  ;;  %v698_v4 = vsel %vm695_vm5, %v2796_v44, %v2797_v60  ;;  %p3192_p1 = scmp.lt.s32.totalorder %s3190_s29, %s3184_s19 }
  0xae   : > { %v2805_v5 = vpop.permute.xlu0 %2804  ;;  %1820 = vmatprep.subr.bf16.mxu0 %v2580_v61  ;;  %v2812_v8 = vunpack.i.h.bf16 %v2810_v1  ;;  %v2811_v0 = vunpack.i.l.bf16 %v2810_v1 }
  0xaf   : > { %v2807_v6 = vunpack.i.h.bf16 %v2805_v5  ;;  %v2806_v7 = vunpack.i.l.bf16 %v2805_v5  ;;  %1821 = vmatpush1.bf16.msra.mxu0 %v2579_v63  ;;  %p3193_p2 = por %p3192_p1, %p3191_p0 }
  0xb0   : > { %v696_v18 = vsel %vm695_vm5, %v2811_v0, %v2812_v8 }
  0xb1   : > { %v700_v9 = vsel %vm695_vm5, %v2802_v3, %v2806_v7  ;;  %v701_v10 = vsel %vm695_vm5, %v2806_v7, %v2807_v6  ;;  %v626_v11 = vpop.permute.xlu1 %625  ;;  %v716_v40 = vsel %vm3624_vm9, %v696_v18, 0.0  ;;  %p3194_p3 = pnand %p3193_p2, %p3187_p13 }
  0xb2   : > { %v637_v12 = vrot.slane %v626_v11, 4  ;;  %v628_v13 = vpop.permute.xlu0 %627  ;;  %v3138_v20 = vpack.c.bf16 %v701_v10, %v699_v46  ;;  %v3142_v37 = vpack.c.bf16 %v700_v9, %v698_v4 }
  0xb3   : > { %v638_v14 = vrot.slane %v628_v13, 4 }
  0xb4   : > { %v1339_v15 = vld [vmem:[#allocation3 + $0xc8] sm:$0xff] }
  0xb5   : > { %v649_v16 = vsel %vm365_vm0, %v637_v12, %v638_v14  ;;  %v618_v17 = vpop.permute.xlu1 %617  ;;  %v2578_v19 = vcombine.high %v2669_v57, %v1339_v15  ;;  %v2577_v23 = vcombine.low %v2669_v57, %v1339_v15 }
  0xb6   : > { %v650_v29 = vsel %vm641_vm10, %v626_v11, %v649_v16  ;;  %v670_v30 = vpop.permute.xlu0 %669  ;;  %v633_v26 = vrot.slane %v618_v17, 4 }
  0xb7   : > { %v697_v35 = vsel %vm695_vm5, %v2812_v8, %v670_v30  ;;  %1822 = vmatprep.subr.bf16.mxu0 %v2578_v19  ;;  %vm1176_vm5 = vcmask 916480  }
  0xb8   : > { %v717_v43 = vsel %vm3618_vm8, %v697_v35, 0.0  ;;  %1823 = vmatpush1.bf16.msra.mxu0 %v2577_v23 }
  0xb9   : > { %v2666_v24 = vpack.c.bf16 %v717_v43, %v716_v40  ;;  %v622_v45 = vpop.permute.xlu1 %621  ;;  %3139 = vmatprep.subr.msk.bf16.mxu0 %vm3708_vm11, %v3138_v20 }
  0xba   : > { %v620_v22 = vpop.permute.xlu0 %619  ;;  %v635_v33 = vrot.slane %v622_v45, 4 }
  0xbb   : > { %v634_v27 = vrot.slane %v620_v22, 4  ;;  %v2574_v36 = vcombine.high %v650_v29, %v2666_v24  ;;  %v2573_v34 = vcombine.low %v650_v29, %v2666_v24 }
  0xbc   : > { %3143 = vmatpush1.bf16.msk.msra.mxu0 %vm3717_vm12, %v3142_v37 }
  0xbd   : > { %v645_v31 = vsel %vm365_vm0, %v633_v26, %v634_v27  ;;  %v2815_v49 = vpop.permute.xlu1 %2814  ;;  %1826 = vmatprep.subr.bf16.mxu0 %v2574_v36 }
  0xbe   : > { %v646_v32 = vsel %vm641_vm10, %v618_v17, %v645_v31  ;;  %v624_v41 = vpop.permute.xlu0 %623  ;;  %v2817_v50 = vunpack.i.h.bf16 %v2815_v49  ;;  %v2816_v51 = vunpack.i.l.bf16 %v2815_v49 }
  0xbf   : > { %v636_v38 = vrot.slane %v624_v41, 4 }
  0xc0   : > { %1827 = vmatpush1.bf16.msra.mxu0 %v2573_v34  ;;  %v478_v56 = vsel %vm469_vm13, %v2816_v51, %v2817_v50 }
  0xc1   : > { %v647_v53 = vsel %vm365_vm0, %v635_v33, %v636_v38  ;;  %v610_v42 = vpop.permute.xlu1 %609  ;;  %v498_v63 = vsel %vm3606_vm6, %v478_v56, 0.0 }
  0xc2   : > { %v648_v28 = vsel %vm641_vm10, %v622_v45, %v647_v53  ;;  %v2820_v39 = vpop.permute.xlu0 %2819  ;;  %v629_v46 = vrot.slane %v610_v42, 4 }
  0xc3   : > { %v2821_v57 = vunpack.i.l.bf16 %v2820_v39  ;;  %v2572_v59 = vcombine.high %v646_v32, %v648_v28  ;;  %v2571_v60 = vcombine.low %v646_v32, %v648_v28  ;;  %v2822_v8 = vunpack.i.h.bf16 %v2820_v39 }
  0xc5   : > { %v479_v44 = vsel %vm469_vm13, %v2817_v50, %v2821_v57  ;;  %v614_v61 = vpop.permute.xlu1 %613  ;;  %1828 = vmatprep.subr.bf16.mxu0 %v2572_v59 }
  0xc6   : > { %v499_v1 = vsel %vm3610_vm7, %v479_v44, 0.0  ;;  %v612_v3 = vpop.permute.xlu0 %611  ;;  %1829 = vmatpush1.bf16.msra.mxu0 %v2571_v60  ;;  %v631_v12 = vrot.slane %v614_v61, 4 }
  0xc7   : > { %v2655_v4 = vpack.c.bf16 %v499_v1, %v498_v63  ;;  %v630_v5 = vrot.slane %v612_v3, 4 }
  0xc9   : > { %536 = vst [vmem:[#allocation3 + $0x78] sm:$0x33] %v2655_v4  ;;  %v640_v6 = vsel %vm365_vm0, %v629_v46, %v630_v5  ;;  %v2825_v7 = vpop.permute.xlu1 %2824 }
  0xca   : > { %v642_v0 = vsel %vm641_vm10, %v610_v42, %v640_v6  ;;  %v2827_v9 = vunpack.i.h.bf16 %v2825_v7  ;;  %v2826_v10 = vunpack.i.l.bf16 %v2825_v7  ;;  %v616_v11 = vpop.permute.xlu0 %615 }
  0xcb   : > { %656 = vst [vmem:[#allocation3 + $0x78] sm:$0xcc] %v642_v0  ;;  %v632_v13 = vrot.slane %v616_v11, 4 }
  0xcc   : > { %v474_v14 = vsel %vm469_vm13, %v2822_v8, %v2826_v10  ;;  %v475_v15 = vsel %vm469_vm13, %v2826_v10, %v2827_v9 }
  0xcd   : > { %v643_v16 = vsel %vm365_vm0, %v631_v12, %v632_v13  ;;  %v2835_v17 = vpop.permute.xlu1 %2834 }
  0xce   : > { %v644_v18 = vsel %vm641_vm10, %v614_v61, %v643_v16  ;;  %v2836_v19 = vunpack.i.l.bf16 %v2835_v17  ;;  %v2830_v23 = vpop.permute.xlu0 %2829  ;;  %v2837_v35 = vunpack.i.h.bf16 %v2835_v17  ;;  %v1368_v17 = vld [vmem:[%s4199_s4 + $0x8] sm:$0xff]  ;;  %vm924_vm10 = vcmask 1039360  }
  0xcf   : > { %v2832_v29 = vunpack.i.h.bf16 %v2830_v23  ;;  %v2831_v30 = vunpack.i.l.bf16 %v2830_v23  ;;  %1390 = vperm.xlu1 %2969, %v1368_v17  }
  0xd1   : > { %v477_v40 = vsel %vm469_vm13, %v2832_v29, %v2836_v19  ;;  %v476_v43 = vsel %vm469_vm13, %v2831_v30, %v2832_v29  ;;  %v2845_v24 = vpop.permute.xlu1 %2844 }
  0xd2   : > { %v2847_v45 = vunpack.i.h.bf16 %v2845_v24  ;;  %v2846_v20 = vunpack.i.l.bf16 %v2845_v24  ;;  %v2840_v22 = vpop.permute.xlu0 %2839  ;;  %v1330_v26 = vld [vmem:[#allocation3 + $0x78] sm:$0xff]  ;;  %v3146_v42 = vpack.c.bf16 %v477_v40, %v475_v15  ;;  %v3150_v44 = vpack.c.bf16 %v476_v43, %v474_v14  ;;  %v1369_v40 = vld [vmem:[%s4199_s4 + $0x10] sm:$0xff] }
  0xd3   : > { %v2842_v27 = vunpack.i.h.bf16 %v2840_v22  ;;  %v2841_v36 = vunpack.i.l.bf16 %v2840_v22  ;;  %v2570_v37 = vcombine.high %v1330_v26, %v644_v18  ;;  %v2569_v31 = vcombine.low %v1330_v26, %v644_v18  ;;  %v1367_v18 = vld [vmem:[%s4199_s4] sm:$0xff]  ;;  %v1370_v43 = vld [vmem:[%s4199_s4 + $0x18] sm:$0xff]  ;;  %1395 = vperm.xlu1 %2969, %v1369_v40  }
  0xd4   : > { %v472_v34 = vsel %vm469_vm13, %v2846_v20, %v2847_v45  ;;  %1385 = vperm.xlu0 %2968, %v1367_v18   ;;  %v1376_v18 = vld [vmem:[%s4199_s4 + $0x48] sm:$0xff] }
  0xd5   : > { %v470_v49 = vsel %vm469_vm13, %v2837_v35, %v2841_v36  ;;  %v471_v32 = vsel %vm469_vm13, %v2841_v36, %v2842_v27  ;;  %v2850_v41 = vpop.permute.xlu1 %2849  ;;  %1830 = vmatprep.subr.bf16.mxu0 %v2570_v37 }
  0xd6   : > { %v2852_v33 = vunpack.i.h.bf16 %v2850_v41  ;;  %v2851_v50 = vunpack.i.l.bf16 %v2850_v41  ;;  %v450_v51 = vpop.permute.xlu0 %449  ;;  %1831 = vmatpush1.bf16.msra.mxu0 %v2569_v31  ;;  %v3158_v11 = vpack.c.bf16 %v472_v34, %v470_v49  ;;  %v1372_v41 = vld [vmem:[%s4199_s4 + $0x28] sm:$0xff] }
  0xd7   : > { %v473_v38 = vsel %vm469_vm13, %v2847_v45, %v450_v51  ;;  %3147 = vmatprep.subr.msk.bf16.mxu0 %vm3748_vm15, %v3146_v42  ;;  %vm1226_vm13 = vcmask 908288  }
  0xd8   : > { %v1042_v39 = vsel %vm1035_vm14, %v2851_v50, %v2852_v33  ;;  %v3155_v6 = vpack.c.bf16 %v473_v38, %v471_v32  ;;  %1400 = vperm.xlu0 %2968, %v1370_v43   ;;  %v1371_v32 = vld [vmem:[%s4199_s4 + $0x20] sm:$0xff] }
  0xd9   : > { %v2860_v28 = vpop.permute.xlu1 %2859  ;;  %v1062_v7 = vsel %vm3606_vm6, %v1042_v39, 0.0  ;;  %1405 = vperm.xlu1 %2969, %v1371_v32  }
  0xda   : > { %v2862_v56 = vunpack.i.h.bf16 %v2860_v28  ;;  %v2861_v57 = vunpack.i.l.bf16 %v2860_v28  ;;  %v2855_v59 = vpop.permute.xlu0 %2854  ;;  %3151 = vmatpush1.bf16.msk.msra.mxu0 %vm3758_vm2, %v3150_v44 }
  0xdb   : > { %v2857_v61 = vunpack.i.h.bf16 %v2855_v59  ;;  %v2856_v63 = vunpack.i.l.bf16 %v2855_v59  ;;  %3156 = vmatprep.subr.msk.bf16.mxu0 %vm3748_vm15, %v3155_v6 }
  0xdc   : > { %v1045_v1 = vsel %vm1035_vm14, %v2861_v57, %v2862_v56  ;;  %1410 = vperm.xlu0 %2968, %v1372_v41  }
  0xdd   : > { %v1065_v3 = vsel %vm3610_vm7, %v1045_v1, 0.0  ;;  %v1044_v46 = vsel %vm1035_vm14, %v2857_v61, %v2861_v57  ;;  %v1043_v4 = vsel %vm1035_vm14, %v2852_v33, %v2856_v63  ;;  %v1148_v5 = vpop.permute.xlu1 %1147  ;;  %v1373_v61 = vld [vmem:[%s4199_s4 + $0x30] sm:$0xff] }
  0xde   : > { %v1064_v8 = vsel %vm3606_vm6, %v1044_v46, 0.0  ;;  %v1063_v0 = vsel %vm3610_vm7, %v1043_v4, 0.0  ;;  %v1166_v9 = vrot.slane %v1148_v5, 4  ;;  %v1146_v10 = vpop.permute.xlu0 %1145  ;;  %3159 = vmatpush1.bf16.msk.msra.mxu0 %vm3758_vm2, %v3158_v11  ;;  %v1374_v4 = vld [vmem:[%s4199_s4 + $0x38] sm:$0xff]  ;;  %1415 = vperm.xlu1 %2969, %v1373_v61   ;;  %v1380_v61 = vld [vmem:[%s4199_s4 + $0x68] sm:$0xff] }
  0xdf   : > { %v2690_v12 = vpack.c.bf16 %v1065_v3, %v1064_v8  ;;  %v3779_v13 = vpack.c.bf16 %v1063_v0, %v1062_v7  ;;  %v1165_v14 = vrot.slane %v1146_v10, 4 }
  0xe0   : > { %1420 = vperm.xlu0 %2968, %v1374_v4  }
  0xe1   : > { %1102 = vst [vmem:[#allocation3 + $0x98] sm:$0x33] %v2690_v12  ;;  %v1175_v15 = vsel %vm365_vm0, %v1165_v14, %v1166_v9  ;;  %v2870_v16 = vpop.permute.xlu1 %2869  ;;  %v1375_v14 = vld [vmem:[%s4199_s4 + $0x40] sm:$0xff] }
  0xe2   : > { %v1177_v19 = vsel %vm1176_vm5, %v1146_v10, %v1175_v15  ;;  %v2871_v23 = vunpack.i.l.bf16 %v2870_v16  ;;  %v2865_v29 = vpop.permute.xlu0 %2864  ;;  %v2872_v34 = vunpack.i.h.bf16 %v2870_v16  ;;  %1425 = vperm.xlu1 %2969, %v1375_v14  }
  0xe3   : > { %1191 = vst [vmem:[#allocation3 + $0x98] sm:$0xcc] %v1177_v19  ;;  %v2867_v30 = vunpack.i.h.bf16 %v2865_v29  ;;  %v2866_v35 = vunpack.i.l.bf16 %v2865_v29 }
  0xe4   : > { %1430 = vperm.xlu0 %2968, %v1376_v18  }
  0xe5   : > { %v932_v24 = vsel %vm924_vm10, %v2867_v30, %v2871_v23  ;;  %v931_v45 = vsel %vm924_vm10, %v2866_v35, %v2867_v30  ;;  %v2880_v20 = vpop.permute.xlu1 %2879 }
  0xe6   : > { %v952_v22 = vsel %vm3618_vm8, %v932_v24, 0.0  ;;  %v951_v26 = vsel %vm3624_vm9, %v931_v45, 0.0  ;;  %v2881_v27 = vunpack.i.l.bf16 %v2880_v20  ;;  %v2875_v36 = vpop.permute.xlu0 %2874  ;;  %v2882_v33 = vunpack.i.h.bf16 %v2880_v20 }
  0xe7   : > { %v3801_v37 = vpack.c.bf16 %v952_v22, %v951_v26  ;;  %v2877_v31 = vunpack.i.h.bf16 %v2875_v36  ;;  %v2876_v49 = vunpack.i.l.bf16 %v2875_v36  ;;  %v1377_v36 = vld [vmem:[%s4199_s4 + $0x50] sm:$0xff] }
  0xe8   : > { %1435 = vperm.xlu1 %2969, %v1377_v36  }
  0xe9   : > { %v1039_v50 = vsel %vm1035_vm14, %v2877_v31, %v2881_v27  ;;  %v1038_v51 = vsel %vm1035_vm14, %v2876_v49, %v2877_v31  ;;  %v2890_v38 = vpop.permute.xlu1 %2889  ;;  %v990_v57 = vrot.slane %v3801_v37, 6  ;;  %v1378_v49 = vld [vmem:[%s4199_s4 + $0x58] sm:$0xff] }
  0xea   : > { %v2892_v42 = vunpack.i.h.bf16 %v2890_v38  ;;  %v2891_v28 = vunpack.i.l.bf16 %v2890_v38  ;;  %v2885_v39 = vpop.permute.xlu0 %2884  ;;  %v1357_v56 = vld [vmem:[#allocation3 + $0x98] sm:$0xff]  ;;  %1440 = vperm.xlu0 %2968, %v1378_v49  }
  0xeb   : > { %v2887_v59 = vunpack.i.h.bf16 %v2885_v39  ;;  %v2886_v44 = vunpack.i.l.bf16 %v2885_v39  ;;  %v2596_v3 = vcombine.high %v3779_v13, %v1357_v56  ;;  %v2595_v46 = vcombine.low %v3779_v13, %v1357_v56  ;;  %v1379_v56 = vld [vmem:[%s4199_s4 + $0x60] sm:$0xff] }
  0xec   : > { %v933_v63 = vsel %vm924_vm10, %v2872_v34, %v2891_v28  ;;  %v934_v1 = vsel %vm924_vm10, %v2891_v28, %v2892_v42  ;;  %v992_v15 = vrot.slane %v990_v57, 4  ;;  %1445 = vperm.xlu1 %2969, %v1379_v56  }
  0xed   : > { %v953_v5 = vsel %vm3624_vm9, %v933_v63, 0.0  ;;  %v954_v6 = vsel %vm3618_vm8, %v934_v1, 0.0  ;;  %v1040_v7 = vsel %vm1035_vm14, %v2882_v33, %v2886_v44  ;;  %v1041_v8 = vsel %vm1035_vm14, %v2886_v44, %v2887_v59  ;;  %v2900_v0 = vpop.permute.xlu1 %2899  ;;  %1836 = vmatprep.subr.bf16.mxu0 %v2596_v3 }
  0xee   : > { %v2685_v9 = vpack.c.bf16 %v954_v6, %v953_v5  ;;  %v2895_v10 = vpop.permute.xlu0 %2894  ;;  %v2901_v11 = vunpack.i.l.bf16 %v2900_v0  ;;  %1837 = vmatpush2.bf16.msra.mxu0 %v2595_v46  ;;  %v2902_v17 = vunpack.i.h.bf16 %v2900_v0  ;;  %v3163_v27 = vpack.c.bf16 %v1041_v8, %v1039_v50  ;;  %1450 = vperm.xlu0 %2968, %v1380_v61  }
  0xef   : > { %v2897_v12 = vunpack.i.h.bf16 %v2895_v10  ;;  %v2896_v13 = vunpack.i.l.bf16 %v2895_v10  ;;  %v3166_v31 = vpack.c.bf16 %v1040_v7, %v1038_v51 }
  0xf0   : > { %v993_v16 = vrot.slane %v2685_v9, 6  ;;  %3164 = vmatprep.subr.msk.bf16.mxu0 %vm3748_vm15, %v3163_v27 }
  0xf1   : > { %v928_v19 = vsel %vm924_vm10, %v2897_v12, %v2901_v11  ;;  %v927_v23 = vsel %vm924_vm10, %v2896_v13, %v2897_v12  ;;  %v2910_v29 = vpop.permute.xlu1 %2909  ;;  %v1381_v11 = vld [vmem:[%s4199_s4 + $0x70] sm:$0xff] }
  0xf2   : > { %v994_v30 = vsel %vm3506_vm3, %v992_v15, %v993_v16  ;;  %v948_v35 = vsel %vm3618_vm8, %v928_v19, 0.0  ;;  %v947_v40 = vsel %vm3624_vm9, %v927_v23, 0.0  ;;  %v2912_v43 = vunpack.i.h.bf16 %v2910_v29  ;;  %v2905_v24 = vpop.permute.xlu0 %2904  ;;  %3167 = vmatpush2.bf16.msk.msra.mxu0 %vm3758_vm2, %v3166_v31  ;;  %v1382_v15 = vld [vmem:[%s4199_s4 + $0x78] sm:$0xff]  ;;  %1455 = vperm.xlu1 %2969, %v1381_v11  }
  0xf3   : > { %v3844_v45 = vpack.c.bf16 %v948_v35, %v947_v40  ;;  %v2911_v20 = vunpack.i.l.bf16 %v2910_v29  ;;  %v2907_v22 = vunpack.i.h.bf16 %v2905_v24  ;;  %v2906_v26 = vunpack.i.l.bf16 %v2905_v24  ;;  %1460 = vperm.xlu0 %2968, %v1382_v15  }
  0xf5   : > { %v984_v32 = vrot.slane %v3844_v45, 6  ;;  %v929_v41 = vsel %vm924_vm10, %v2902_v17, %v2906_v26  ;;  %v930_v53 = vsel %vm924_vm10, %v2906_v26, %v2907_v22  ;;  %v2915_v34 = vpop.permute.xlu1 %2914  ;;  %v1036_v33 = vsel %vm1035_vm14, %v2911_v20, %v2912_v43 }
  0xf6   : > { %v949_v50 = vsel %vm3624_vm9, %v929_v41, 0.0  ;;  %v950_v60 = vsel %vm3618_vm8, %v930_v53, 0.0  ;;  %v2917_v51 = vunpack.i.h.bf16 %v2915_v34  ;;  %v2916_v38 = vunpack.i.l.bf16 %v2915_v34  ;;  %v1010_v42 = vpop.permute.xlu0 %1009 }
  0xf7   : > { %v2683_v28 = vpack.c.bf16 %v950_v60, %v949_v50  ;;  %v1037_v39 = vsel %vm1035_vm14, %v2912_v43, %v1010_v42  ;;  %v1056_v59 = vsel %vm3606_vm6, %v1036_v33, 0.0  ;;  %v986_v63 = vrot.slane %v984_v32, 4 }
  0xf8   : > { %v1057_v44 = vsel %vm3610_vm7, %v1037_v39, 0.0  ;;  %v925_v4 = vsel %vm924_vm10, %v2916_v38, %v2917_v51 }
  0xf9   : > { %v987_v1 = vrot.slane %v2683_v28, 6  ;;  %v2686_v3 = vpack.c.bf16 %v1057_v44, %v1056_v59  ;;  %v2920_v46 = vpop.permute.xlu1 %2919  ;;  %v945_v12 = vsel %vm3624_vm9, %v925_v4, 0.0  ;;  %v3134_v4 = vld [vmem:[#allocation3 + $0x50] sm:$0xff] }
  0xfa   : > { %v2922_v5 = vunpack.i.h.bf16 %v2920_v46  ;;  %v2921_v6 = vunpack.i.l.bf16 %v2920_v46  ;;  %v899_v7 = vpop.permute.xlu0 %898  ;;  %v3133_v46 = vld [vmem:[#allocation3 + $0x68] sm:$0xff] }
  0xfb   : > { %v988_v8 = vsel %vm3506_vm3, %v986_v63, %v987_v1  ;;  %v989_v0 = vrot.slane %v987_v1, 4  ;;  %v926_v9 = vsel %vm924_vm10, %v2917_v51, %v899_v7  ;;  %v2592_v10 = vcombine.high %v994_v30, %v2686_v3 }
  0xfc   : > { %v946_v13 = vsel %vm3618_vm8, %v926_v9, 0.0  ;;  %v2591_v14 = vcombine.low %v994_v30, %v2686_v3  ;;  %v1235_v30 = vsel %vm1226_vm13, %v2921_v6, %v2922_v5 }
  0xfd   : > { %v991_v16 = vsel %vm3506_vm3, %v989_v0, %v990_v57  ;;  %v2681_v17 = vpack.c.bf16 %v946_v13, %v945_v12  ;;  %v2930_v18 = vpop.permute.xlu1 %2929  ;;  %1840 = vmatprep.subr.bf16.mxu0 %v2592_v10  ;;  %v1255_v36 = vsel %vm3624_vm9, %v1235_v30, 0.0  ;;  %v1344_v0 = vld [vmem:[#allocation3 + $0x138] sm:$0xff]  ;;  %v2585_v13 = vcombine.low %v3133_v46, %v3134_v4 }
  0xfe   : > { %v2932_v19 = vunpack.i.h.bf16 %v2930_v18  ;;  %v2931_v23 = vunpack.i.l.bf16 %v2930_v18  ;;  %v2925_v29 = vpop.permute.xlu0 %2924  ;;  %1841 = vmatpush2.bf16.msra.mxu0 %v2591_v14  ;;  %v2590_v35 = vcombine.high %v988_v8, %v991_v16  ;;  %v2589_v57 = vcombine.low %v988_v8, %v991_v16 }
  0xff   : > { %v982_v40 = vrot.slane %v2681_v17, 6  ;;  %v2927_v43 = vunpack.i.h.bf16 %v2925_v29  ;;  %v2926_v24 = vunpack.i.l.bf16 %v2925_v29  ;;  %v3135_v17 = vld [vmem:[#allocation3 + $0x30] sm:$0xff] }
 0x100   : > { %v3897_v37 = vsel %vm1226_vm13, %v2931_v23, %v2932_v19  ;;  %1842 = vmatprep.subr.bf16.mxu0 %v2590_v35  ;;  %v2584_v18 = vcombine.high %v1344_v0, %v3135_v17 }
 0x101   : > { %v983_v20 = vrot.slane %v982_v40, 4  ;;  %1000 = vst [vmem:[#allocation3 + $0x80] sm:$0xcc] %v982_v40  ;;  %v3900_v22 = vsel %vm1226_vm13, %v2927_v43, %v2931_v23  ;;  %v1236_v26 = vsel %vm1226_vm13, %v2922_v5, %v2926_v24  ;;  %v2940_v27 = vpop.permute.xlu1 %2939  ;;  %v2586_v5 = vcombine.high %v3133_v46, %v3134_v4 }
 0x102   : > { %v1256_v31 = vsel %vm3618_vm8, %v1236_v26, 0.0  ;;  %v2941_v49 = vunpack.i.l.bf16 %v2940_v27  ;;  %v2935_v41 = vpop.permute.xlu0 %2934  ;;  %1843 = vmatpush2.bf16.msra.mxu0 %v2589_v57  ;;  %v2942_v28 = vunpack.i.h.bf16 %v2940_v27  ;;  %v2583_v40 = vcombine.low %v1344_v0, %v3135_v17  ;;  %v2984_v17 = vld [vmem:[%s4198_s3 + $0x4c] ss:$12 sps:$4 sm:$0xff]  }
 0x103   : > { %v985_v53 = vsel %vm3506_vm3, %v983_v20, %v984_v32  ;;  %v2700_v34 = vpack.c.bf16 %v1256_v31, %v1255_v36  ;;  %v2937_v33 = vunpack.i.h.bf16 %v2935_v41  ;;  %v2936_v50 = vunpack.i.l.bf16 %v2935_v41 }
 0x105   : > { %1293 = vst [vmem:[#allocation3 + $0x28] sm:$0x33] %v2700_v34  ;;  %v1234_v60 = vsel %vm1226_vm13, %v2937_v33, %v2941_v49  ;;  %v2950_v51 = vpop.permute.xlu1 %2949  ;;  %v1233_v2 = vsel %vm1226_vm13, %v2936_v50, %v2937_v33  ;;  %v858_v50 = vrot.slane %v856_v25, 4 }
 0x106   : > { %v2952_v38 = vunpack.i.h.bf16 %v2950_v51  ;;  %v2951_v62 = vunpack.i.l.bf16 %v2950_v51  ;;  %v2945_v42 = vpop.permute.xlu0 %2944  ;;  %v3170_v26 = vpack.c.bf16 %v1234_v60, %v3897_v37  ;;  %v3175_v37 = vpack.c.bf16 %v1233_v2, %v3900_v22 }
 0x107   : > { %v2947_v39 = vunpack.i.h.bf16 %v2945_v42  ;;  %v2946_v56 = vunpack.i.l.bf16 %v2945_v42 }
 0x108   : > { %v1348_v59 = vld [vmem:[#allocation3 + $0x80] sm:$0xff]  ;;  %v3918_v61 = vsel %vm1226_vm13, %v2951_v62, %v2952_v38 }
 0x109   : > { %v3914_v45 = vsel %vm1226_vm13, %v2942_v28, %v2946_v56  ;;  %v1228_v32 = vsel %vm1226_vm13, %v2946_v56, %v2947_v39  ;;  %v2955_v44 = vpop.permute.xlu1 %2954  ;;  %v2588_v63 = vcombine.high %v1348_v59, %v985_v53  ;;  %v2587_v8 = vcombine.low %v1348_v59, %v985_v53 }
 0x10a   : > { %v2957_v1 = vunpack.i.h.bf16 %v2955_v44  ;;  %v1207_v3 = vpop.permute.xlu0 %1206  ;;  %v2956_v6 = vunpack.i.l.bf16 %v2955_v44  ;;  %v3182_v25 = vpack.c.bf16 %v3918_v61, %v3914_v45  ;;  %v2976_v61 = vld [vmem:[%s4198_s3 + $0x1c] ss:$12 sps:$4 sm:$0xff]  }
 0x10b   : > { %v1230_v7 = vsel %vm1226_vm13, %v2952_v38, %v1207_v3  ;;  %1844 = vmatprep.subr.bf16.mxu0 %v2588_v63 }
 0x10c   : > { %v1366_v9 = vld [vmem:[#allocation3 + $0x28] sm:$0x33]  ;;  %1845 = vmatpush2.bf16.msra.mxu0 %v2587_v8  ;;  %v800_v19 = vsel %vm793_vm4, %v2956_v6, %v2957_v1  ;;  %v3178_v55 = vpack.c.bf16 %v1230_v7, %v1228_v32 }
 0x10d   : > { %v2965_v10 = vpop.permute.xlu1 %2964  ;;  %v2606_v11 = vcombine.high %v1366_v9, %v1366_v9  ;;  %v2605_v12 = vcombine.low %v1366_v9, %v1366_v9  ;;  %1846 = vmatprep.subr.bf16.mxu0 %v2586_v5  ;;  %v820_v27 = vsel %vm3606_vm6, %v800_v19, 0.0  ;;  %v2987_v19 = vld [vmem:[%s4198_s3 + $0x38] ss:$12 sps:$4 sm:$0xff]  }
 0x10e   : > { %v2967_v14 = vunpack.i.h.bf16 %v2965_v10  ;;  %v2966_v15 = vunpack.i.l.bf16 %v2965_v10  ;;  %v2960_v16 = vpop.permute.xlu0 %2959 }
 0x10f   : > { %v2962_v23 = vunpack.i.h.bf16 %v2960_v16  ;;  %v2961_v29 = vunpack.i.l.bf16 %v2960_v16  ;;  %2607 = vmatprep.subr.msk.bf16.mxu1 %vm580_vm1, %v2606_v11  ;;  %v1815_v35 = vsel %vm580_vm1, %v2605_v12, 0  ;;  %v2978_v12 = vld [vmem:[%s4198_s3 + $0x18] ss:$12 sps:$4 sm:$0xff]   ;;  %v2983_v16 = vld [vmem:[%s4198_s3 + $0x20] ss:$12 sps:$4 sm:$0xff]  }
 0x110   : > { %v803_v30 = vsel %vm793_vm4, %v2966_v15, %v2967_v14  ;;  %1940 = vmatpush1.bf16.msra.mxu1 %v1815_v35  ;;  %1847 = vmatpush2.bf16.msra.mxu0 %v2585_v13  ;;  %v2979_v13 = vld [vmem:[%s4198_s3 + $0x8] ss:$12 sps:$4 sm:$0xff]   ;;  %v2991_v35 = vld [vmem:[%s4198_s3 + $0x50] ss:$12 sps:$4 sm:$0xff]  }
 0x111   : > { %v823_v43 = vsel %vm3610_vm7, %v803_v30, 0.0  ;;  %v802_v24 = vsel %vm793_vm4, %v2962_v23, %v2966_v15  ;;  %v801_v57 = vsel %vm793_vm4, %v2957_v1, %v2961_v29  ;;  %v1160_v20 = vpop.permute.xlu1 %1159  ;;  %3171 = vmatprep.subr.msk.bf16.mxu1 %vm3708_vm11, %v3170_v26  ;;  %1848 = vmatprep.subr.bf16.mxu0 %v2584_v18  ;;  %v2980_v14 = vld [vmem:[%s4198_s3 + $0x34] ss:$12 sps:$4 sm:$0xff]   ;;  %v2982_v15 = vld [vmem:[%s4198_s3 + $0x30] ss:$12 sps:$4 sm:$0xff]  }
 0x112   : > { %v822_v36 = vsel %vm3606_vm6, %v802_v24, 0.0  ;;  %v821_v31 = vsel %vm3610_vm7, %v801_v57, 0.0  ;;  %v1172_v49 = vrot.slane %v1160_v20, 4  ;;  %v1158_v41 = vpop.permute.xlu0 %1157  ;;  %v2986_v18 = vld [vmem:[%s4198_s3 + $0x48] ss:$12 sps:$4 sm:$0xff]  }
 0x113   : > { %v2675_v53 = vpack.c.bf16 %v823_v43, %v822_v36  ;;  %v2674_v34 = vpack.c.bf16 %v821_v31, %v820_v27  ;;  %v1171_v33 = vrot.slane %v1158_v41, 4  ;;  %v2988_v23 = vld [vmem:[%s4198_s3 + $0x64] ss:$12 sps:$4 sm:$0xff]   ;;  %v2990_v29 = vld [vmem:[%s4198_s3 + $0x60] ss:$12 sps:$4 sm:$0xff]  }
 0x114   : > { %3176 = vmatpush1.bf16.msk.msra.mxu1 %vm3717_vm12, %v3175_v37  ;;  %1849 = vmatpush2.bf16.msra.mxu0 %v2583_v40  ;;  %v2992_v30 = vld [vmem:[%s4198_s3 + $0x7c] ss:$12 sps:$4 sm:$0xff]   ;;  %v2994_v40 = vld [vmem:[%s4198_s3 + $0x78] ss:$12 sps:$4 sm:$0xff]   ;;  %v2996_v24 = vld [vmem:[%s4198_s3 + $0x94] ss:$12 sps:$4 sm:$0xff]  }
 0x115   : > { %v859_v60 = vrot.slane %v2674_v34, 6  ;;  %v1182_v54 = vsel %vm365_vm0, %v1171_v33, %v1172_v49  ;;  %v1164_v51 = vpop.permute.xlu1 %1163  ;;  %3179 = vmatprep.subr.msk.bf16.mxu1 %vm3708_vm11, %v3178_v55  ;;  %v862_v22 = vrot.slane %v2675_v53, 6  ;;  %v2995_v43 = vld [vmem:[%s4198_s3 + $0x68] ss:$12 sps:$4 sm:$0xff]   ;;  %v2998_v57 = vld [vmem:[%s4198_s3 + $0x90] ss:$12 sps:$4 sm:$0xff]  }
 0x116   : > { %v1183_v38 = vsel %vm1176_vm5, %v1158_v41, %v1182_v54  ;;  %v1174_v62 = vrot.slane %v1164_v51, 4  ;;  %v1162_v42 = vpop.permute.xlu0 %1161  ;;  %v2999_v20 = vld [vmem:[%s4198_s3 + $0x80] ss:$12 sps:$4 sm:$0xff]   ;;  %v3002_v27 = vld [vmem:[%s4198_s3 + $0xa8] ss:$12 sps:$4 sm:$0xff]  }
 0x117   : > { %v860_v2 = vsel %vm3506_vm3, %v858_v50, %v859_v60  ;;  %v861_v28 = vrot.slane %v859_v60, 4  ;;  %v1173_v47 = vrot.slane %v1162_v42, 4  ;;  %v3000_v26 = vld [vmem:[%s4198_s3 + $0xac] ss:$12 sps:$4 sm:$0xff]   ;;  %v3004_v31 = vld [vmem:[%s4198_s3 + $0xb0] ss:$12 sps:$4 sm:$0xff]  }
 0x118   : > { %3183 = vmatpush1.bf16.msk.msra.mxu1 %vm3717_vm12, %v3182_v25  ;;  %v3003_v36 = vld [vmem:[%s4198_s3 + $0x98] ss:$12 sps:$4 sm:$0xff]  }
 0x119   : > { %v863_v48 = vsel %vm3506_vm3, %v861_v28, %v862_v22  ;;  %v1184_v39 = vsel %vm365_vm0, %v1173_v47, %v1174_v62  ;;  %v1152_v56 = vpop.permute.xlu1 %1151 }
 0x11a   : > { %v1185_v59 = vsel %vm1176_vm5, %v1162_v42, %v1184_v39  ;;  %v1168_v32 = vrot.slane %v1152_v56, 4  ;;  %v1150_v44 = vpop.permute.xlu0 %1149  ;;  %v2582_v63 = vcombine.high %v860_v2, %v863_v48  ;;  %v2581_v1 = vcombine.low %v860_v2, %v863_v48 }
 0x11b   : > { %v1167_v3 = vrot.slane %v1150_v44, 4  ;;  %v2600_v46 = vcombine.high %v1183_v38, %v1185_v59  ;;  %v2599_v4 = vcombine.low %v1183_v38, %v1185_v59 }
 0x11c   : > { %1850 = vmatprep.subr.bf16.mxu0 %v2582_v63 }
 0x11d   : > { %v1178_v58 = vsel %vm365_vm0, %v1167_v3, %v1168_v32  ;;  %v1156_v45 = vpop.permute.xlu1 %1155  ;;  %1851 = vmatpush2.bf16.msra.mxu0 %v2581_v1  ;;  %1945 = vmatprep.subr.bf16.mxu1 %v2600_v46 }
 0x11e   : > { %v1179_v5 = vsel %vm1176_vm5, %v1150_v44, %v1178_v58  ;;  %v1170_v6 = vrot.slane %v1156_v45, 4  ;;  %v1154_v7 = vpop.permute.xlu0 %1153  ;;  %1946 = vmatpush1.bf16.msra.mxu1 %v2599_v4 }
 0x11f   : > { %v1169_v8 = vrot.slane %v1154_v7, 4 }
 0x120   : > { %1853 = vmatmul.mubr.bf16.vlgmr.msra.gmra.mxu0 %v2973_v21 }
 0x121   : > { %v1180_v0 = vsel %vm365_vm0, %v1169_v8, %v1170_v6  ;;  %1862 = vmatprep.mubr.bf16.mxu0 %v2976_v61  ;;  %vm1788_vm0 = vcmask 556032  }
 0x122   : > { %v1181_v9 = vsel %vm1176_vm5, %v1154_v7, %v1180_v0 }
 0x123   : > { %v2598_v10 = vcombine.high %v1179_v5, %v1181_v9  ;;  %v2597_v11 = vcombine.low %v1179_v5, %v1181_v9 }
 0x125   : > { %1947 = vmatprep.subr.bf16.mxu1 %v2598_v10 }
 0x126   : > { %1948 = vmatpush1.bf16.msra.mxu1 %v2597_v11 }
 0x128   : > { %1863 = vmatmul.mubr.bf16.gmra.mxu0 %v2978_v12 }
 0x129   : > { %2608 = vmatmul.mubr.msk.bf16.vlgmr.msra.gmra.mxu1 %vm1788_vm0, %v2979_v13  ;;  %1872 = vmatprep.mubr.bf16.mxu0 %v2980_v14 }
 0x12a   : > { %1975 = vmatprep.mubr.bf16.mxu1 %v3286_v52 }
 0x130   : > { %1873 = vmatmul.mubr.bf16.gmra.mxu0 %v2982_v15 }
 0x131   : > { %2609 = vmatmul.mubr.msk.bf16.gmra.mxu1 %vm1788_vm0, %v2983_v16  ;;  %1882 = vmatprep.mubr.bf16.mxu0 %v2984_v17 }
 0x132   : > { %1985 = vmatprep.mubr.bf16.mxu1 %v3286_v52 }
 0x138   : > { %1883 = vmatmul.mubr.bf16.gmra.mxu0 %v2986_v18 }
 0x139   : > { %2610 = vmatmul.mubr.msk.bf16.gmra.mxu1 %vm1788_vm0, %v2987_v19  ;;  %1892 = vmatprep.mubr.bf16.mxu0 %v2988_v23 }
 0x13a   : > { %1995 = vmatprep.mubr.bf16.mxu1 %v3286_v52 }
 0x140   : > { %1893 = vmatmul.mubr.bf16.gmra.mxu0 %v2990_v29 }
 0x141   : > { %2611 = vmatmul.mubr.msk.bf16.gmra.mxu1 %vm1788_vm0, %v2991_v35  ;;  %1902 = vmatprep.mubr.bf16.mxu0 %v2992_v30 }
 0x142   : > { %2005 = vmatprep.mubr.bf16.mxu1 %v3286_v52 }
 0x148   : > { %1903 = vmatmul.mubr.bf16.gmra.mxu0 %v2994_v40 }
 0x149   : > { %2612 = vmatmul.mubr.msk.bf16.gmra.mxu1 %vm1788_vm0, %v2995_v43  ;;  %1912 = vmatprep.mubr.bf16.mxu0 %v2996_v24 }
 0x14a   : > { %2015 = vmatprep.mubr.bf16.mxu1 %v3286_v52  ;;  %v1391_v50 = vpop.permute.xlu1 %1390 }
 0x14f   : > { %v1386_v33 = vpop.permute.xlu0 %1385 }
 0x150   : > { %1913 = vmatmul.mubr.bf16.gmra.mxu0 %v2998_v57 }
 0x151   : > { %2613 = vmatmul.mubr.msk.bf16.gmra.mxu1 %vm1788_vm0, %v2999_v20  ;;  %1922 = vmatprep.mubr.bf16.mxu0 %v3000_v26 }
 0x152   : > { %2025 = vmatprep.mubr.bf16.mxu1 %v3286_v52 }
 0x153   : > { %v1401_v44 = vpop.permute.xlu0 %1400 }
 0x157   : > { %v1411_v23 = vpop.permute.xlu0 %1410 }
 0x158   : > { %1923 = vmatmul.mubr.bf16.gmra.mxu0 %v3002_v27 }
 0x159   : > { %2614 = vmatmul.mubr.msk.bf16.gmra.mxu1 %vm1788_vm0, %v3003_v36 }
 0x15a   : > { %2035 = vmatprep.mubr.bf16.mxu1 %v3286_v52  ;;  %v1396_v52 = vpop.permute.xlu1 %1395 }
 0x15e   : > { %v1406_v6 = vpop.permute.xlu1 %1405 }
 0x161   : > { %2615 = vmatmul.mubr.msk.bf16.gmra.mxu1 %vm1788_vm0, %v3004_v31 }
 0x162   : > { %v1416_v24 = vpop.permute.xlu1 %1415 }
 0x1e0   : > { %v1854_v49 = vpop.f32.mrf.mxu0 }
 0x1e1   : > { %v1855_v51 = vadd.f32 %v1854_v49, %v1386_v33 }
 0x1e2   : > { %v1856_v41 = vpop.f32.mrf.mxu0 }
 0x1e3   : > { %v1857_v42 = vadd.f32 %v1856_v41, %v1386_v33 }
 0x1e4   : > { %v1858_v53 = vpop.f32.mrf.mxu0 }
 0x1e5   : > { %v1859_v2 = vadd.f32 %v1858_v53, %v1391_v50 }
 0x1e6   : > { %v1860_v34 = vpop.f32.mrf.mxu0 }
 0x1e7   : > { %v1861_v56 = vadd.f32 %v1860_v34, %v1391_v50 }
 0x1e8   : > { %v1864_v37 = vpop.f32.mrf.mxu0 }
 0x1e9   : > { %v1967_v60 = vpop.f32.mrf.mxu1  ;;  %v1865_v48 = vadd.f32 %v1864_v37, %v1396_v52 }
 0x1ea   : > { %v1866_v54 = vpop.f32.mrf.mxu0  ;;  %v1968_v28 = vadd.f32 %v1967_v60, %v1855_v51 }
 0x1eb   : > { %v1969_v55 = vpop.f32.mrf.mxu1  ;;  %v1867_v3 = vadd.f32 %v1866_v54, %v1396_v52 }
 0x1ec   : > { %v1868_v38 = vpop.f32.mrf.mxu0  ;;  %v1970_v25 = vadd.f32 %v1969_v55, %v1857_v42  ;;  %v2616_v1 = vmul.f32 -1.442695, %v1968_v28 }
 0x1ed   : > { %v1971_v62 = vpop.f32.mrf.mxu1  ;;  %v1869_v5 = vadd.f32 %v1868_v38, %v1401_v44 }
 0x1ee   : > { %v1870_v22 = vpop.f32.mrf.mxu0  ;;  %v1972_v59 = vadd.f32 %v1971_v62, %v1859_v2  ;;  %v2617_v21 = vmul.f32 -1.442695, %v1970_v25  ;;  %3005 = vpow2.f32 %v2616_v1  ;;  %v1426_v1 = vpop.permute.xlu1 %1425 }
 0x1ef   : > { %v1973_v47 = vpop.f32.mrf.mxu1  ;;  %v1871_v49 = vadd.f32 %v1870_v22, %v1401_v44 }
 0x1f0   : > { %v1874_v39 = vpop.f32.mrf.mxu0  ;;  %v1974_v46 = vadd.f32 %v1973_v47, %v1861_v56  ;;  %v2618_v61 = vmul.f32 -1.442695, %v1972_v59  ;;  %3007 = vpow2.f32 %v2617_v21  ;;  %v1421_v59 = vpop.permute.xlu0 %1420 }
 0x1f1   : > { %v1977_v32 = vpop.f32.mrf.mxu1  ;;  %v1875_v0 = vadd.f32 %v1874_v39, %v1406_v6 }
 0x1f2   : > { %v1876_v63 = vpop.f32.mrf.mxu0  ;;  %v1978_v58 = vadd.f32 %v1977_v32, %v1865_v48  ;;  %v2619_v10 = vmul.f32 -1.442695, %v1974_v46  ;;  %3009 = vpow2.f32 %v2618_v61 }
 0x1f3   : > { %v1979_v4 = vpop.f32.mrf.mxu1  ;;  %v1877_v17 = vadd.f32 %v1876_v63, %v1406_v6 }
 0x1f4   : > { %v1878_v45 = vpop.f32.mrf.mxu0  ;;  %v1980_v7 = vadd.f32 %v1979_v4, %v1867_v3  ;;  %v2620_v13 = vmul.f32 -1.442695, %v1978_v58  ;;  %3011 = vpow2.f32 %v2619_v10 }
 0x1f5   : > { %v1981_v8 = vpop.f32.mrf.mxu1  ;;  %v1879_v30 = vadd.f32 %v1878_v45, %v1411_v23 }
 0x1f6   : > { %v1880_v9 = vpop.f32.mrf.mxu0  ;;  %v1982_v11 = vadd.f32 %v1981_v8, %v1869_v5  ;;  %v2621_v15 = vmul.f32 -1.442695, %v1980_v7  ;;  %3013 = vpow2.f32 %v2620_v13 }
 0x1f7   : > { %v1983_v12 = vpop.f32.mrf.mxu1  ;;  %v1881_v20 = vadd.f32 %v1880_v9, %v1411_v23 }
 0x1f8   : > { %v1884_v14 = vpop.f32.mrf.mxu0  ;;  %v2622_v29 = vmul.f32 -1.442695, %v1982_v11  ;;  %3015 = vpow2.f32 %v2621_v15  ;;  %v1984_v37 = vadd.f32 %v1983_v12, %v1871_v49 }
 0x1f9   : > { %v1987_v16 = vpop.f32.mrf.mxu1  ;;  %v1885_v26 = vadd.f32 %v1884_v14, %v1416_v24 }
 0x1fa   : > { %v1988_v18 = vadd.f32 %v1987_v16, %v1875_v0  ;;  %v1886_v19 = vpop.f32.mrf.mxu0  ;;  %3017 = vpow2.f32 %v2622_v29  ;;  %v2623_v28 = vmul.f32 -1.442695, %v1984_v37 }
 0x1fb   : > { %v1989_v35 = vpop.f32.mrf.mxu1  ;;  %v3006_v38 = vpop.eup %3005  ;;  %v1887_v62 = vadd.f32 %v1886_v19, %v1416_v24 }
 0x1fc   : > { %v1990_v40 = vadd.f32 %v1989_v35, %v1877_v17  ;;  %v1888_v43 = vpop.f32.mrf.mxu0  ;;  %v2624_v27 = vmul.f32 -1.442695, %v1988_v18  ;;  %v2110_v56 = vadd.f32 1.0, %v3006_v38  ;;  %v1431_v18 = vpop.permute.xlu0 %1430 }
 0x1fd   : > { %v1991_v57 = vpop.f32.mrf.mxu1  ;;  %v3008_v2 = vpop.eup %3007  ;;  %v1889_v3 = vadd.f32 %v1888_v43, %v1421_v59 }
 0x1fe   : > { %v1992_v36 = vadd.f32 %v1991_v57, %v1879_v30  ;;  %v1890_v31 = vpop.f32.mrf.mxu0  ;;  %v2625_v53 = vmul.f32 -1.442695, %v1990_v40  ;;  %3019 = vpow2.f32 %v2624_v27  ;;  %v2111_v63 = vadd.f32 1.0, %v3008_v2 }
 0x1ff   : > { %v1993_v41 = vpop.f32.mrf.mxu1  ;;  %v3010_v47 = vpop.eup %3009  ;;  %v1891_v5 = vadd.f32 %v1890_v31, %v1421_v59 }
 0x200   : > { %v1994_v34 = vadd.f32 %v1993_v41, %v1881_v20  ;;  %v1894_v33 = vpop.f32.mrf.mxu0  ;;  %v2626_v60 = vmul.f32 -1.442695, %v1992_v36  ;;  %3021 = vpow2.f32 %v2625_v53  ;;  %v2112_v21 = vadd.f32 1.0, %v3010_v47  ;;  %v1436_v41 = vpop.permute.xlu1 %1435 }
 0x201   : > { %v1997_v50 = vpop.f32.mrf.mxu1  ;;  %v3012_v44 = vpop.eup %3011  ;;  %v1895_v58 = vadd.f32 %v1894_v33, %v1426_v1 }
 0x202   : > { %v1998_v54 = vadd.f32 %v1997_v50, %v1885_v26  ;;  %v1896_v51 = vpop.f32.mrf.mxu0  ;;  %v2627_v52 = vmul.f32 -1.442695, %v1994_v34  ;;  %3023 = vpow2.f32 %v2626_v60  ;;  %v2113_v0 = vadd.f32 1.0, %v3012_v44 }
 0x203   : > { %v1999_v55 = vpop.f32.mrf.mxu1  ;;  %v3014_v4 = vpop.eup %3013  ;;  %v1897_v15 = vadd.f32 %v1896_v51, %v1426_v1 }
 0x204   : > { %v1898_v42 = vpop.f32.mrf.mxu0  ;;  %v2628_v25 = vmul.f32 -1.442695, %v1998_v54  ;;  %v2000_v48 = vadd.f32 %v1999_v55, %v1887_v62  ;;  %3025 = vpow2.f32 %v2627_v52  ;;  %v2114_v11 = vadd.f32 1.0, %v3014_v4 }
 0x205   : > { %v2001_v22 = vpop.f32.mrf.mxu1  ;;  %3027 = vpow2.f32 %v2623_v28  ;;  %v3016_v61 = vpop.eup %3015  ;;  %v1899_v30 = vadd.f32 %v1898_v42, %v1431_v18 }
 0x206   : > { %v1900_v39 = vpop.f32.mrf.mxu0  ;;  %3029 = vpow2.f32 %v2628_v25  ;;  %v2629_v6 = vmul.f32 -1.442695, %v2000_v48  ;;  %v2002_v7 = vadd.f32 %v2001_v22, %v1889_v3  ;;  %v2115_v14 = vadd.f32 1.0, %v3016_v61  ;;  %v1441_v28 = vpop.permute.xlu0 %1440 }
 0x207   : > { %v2003_v32 = vpop.f32.mrf.mxu1  ;;  %3031 = vrcp.f32 %v2110_v56  ;;  %v3018_v10 = vpop.eup %3017  ;;  %v1901_v26 = vadd.f32 %v1900_v39, %v1431_v18 }
 0x208   : > { %v1904_v46 = vpop.f32.mrf.mxu0  ;;  %3033 = vrcp.f32 %v2111_v63  ;;  %v2004_v12 = vadd.f32 %v2003_v32, %v1891_v5  ;;  %v2630_v19 = vmul.f32 -1.442695, %v2002_v7  ;;  %v2116_v35 = vadd.f32 1.0, %v3018_v10  ;;  %v1446_v32 = vpop.permute.xlu1 %1445 }
 0x209   : > { %v2007_v45 = vpop.f32.mrf.mxu1  ;;  %3035 = vrcp.f32 %v2112_v21  ;;  %v1905_v33 = vadd.f32 %v1904_v46, %v1436_v41 }
 0x20a   : > { %v1906_v8 = vpop.f32.mrf.mxu0  ;;  %v2008_v16 = vadd.f32 %v2007_v45, %v1895_v58  ;;  %3037 = vpow2.f32 %v2629_v6  ;;  %v2631_v24 = vmul.f32 -1.442695, %v2004_v12 }
 0x20b   : > { %v2009_v9 = vpop.f32.mrf.mxu1  ;;  %v3020_v29 = vpop.eup %3019  ;;  %3039 = vrcp.f32 %v2113_v0  ;;  %v1907_v22 = vadd.f32 %v1906_v8, %v1436_v41 }
 0x20c   : > { %v4045_v13 = vpop.f32.mrf.mxu0  ;;  %v2010_v40 = vadd.f32 %v2009_v9, %v1897_v15  ;;  %3041 = vrcp.f32 %v2114_v11  ;;  %v2632_v27 = vmul.f32 -1.442695, %v2008_v16  ;;  %v2166_v49 = vadd.f32 1.0, %v3020_v29  ;;  %v1451_v0 = vpop.permute.xlu0 %1450 }
 0x20d   : > { %v2011_v17 = vpop.f32.mrf.mxu1  ;;  %v3022_v20 = vpop.eup %3021  ;;  %3043 = vrcp.f32 %v2115_v14  ;;  %v1909_v45 = vadd.f32 %v4045_v13, %v1441_v28 }
 0x20e   : > { %v4047_v23 = vpop.f32.mrf.mxu0  ;;  %v2012_v36 = vadd.f32 %v2011_v17, %v1899_v30  ;;  %3045 = vpow2.f32 %v2630_v19  ;;  %v2633_v37 = vmul.f32 -1.442695, %v2010_v40  ;;  %v2167_v54 = vadd.f32 1.0, %v3022_v20 }
 0x20f   : > { %v2013_v43 = vpop.f32.mrf.mxu1  ;;  %v3024_v34 = vpop.eup %3023  ;;  %3047 = vrcp.f32 %v2116_v35  ;;  %v1911_v18 = vadd.f32 %v4047_v23, %v1441_v28 }
 0x210   : > { %v1914_v57 = vpop.f32.mrf.mxu0  ;;  %v2014_v50 = vadd.f32 %v2013_v43, %v1901_v26  ;;  %3049 = vpow2.f32 %v2631_v24  ;;  %v2634_v38 = vmul.f32 -1.442695, %v2012_v36  ;;  %v2168_v2 = vadd.f32 1.0, %v3024_v34  ;;  %v1456_v43 = vpop.permute.xlu1 %1455 }
 0x211   : > { %v2017_v31 = vpop.f32.mrf.mxu1  ;;  %v3026_v55 = vpop.eup %3025  ;;  %3051 = vpow2.f32 %v2632_v27  ;;  %v1915_v3 = vadd.f32 %v1914_v57, %v1446_v32 }
 0x212   : > { %v1916_v53 = vpop.f32.mrf.mxu0  ;;  %v2018_v62 = vadd.f32 %v2017_v31, %v1905_v33  ;;  %v4049_v42 = vpop.eup %3027  ;;  %3053 = vrcp.f32 %v2166_v49  ;;  %v2635_v48 = vmul.f32 -1.442695, %v2014_v50  ;;  %v2169_v59 = vadd.f32 1.0, %v3026_v55 }
 0x213   : > { %v2019_v60 = vpop.f32.mrf.mxu1  ;;  %v3030_v25 = vpop.eup %3029  ;;  %3055 = vpow2.f32 %v2633_v37  ;;  %v1917_v5 = vadd.f32 %v1916_v53, %v1446_v32 }
 0x214   : > { %v1918_v51 = vpop.f32.mrf.mxu0  ;;  %v4051_v56 = vpop.eup %3031  ;;  %3057 = vrcp.f32 %v2167_v54  ;;  %v2020_v44 = vadd.f32 %v2019_v60, %v1907_v22  ;;  %v2636_v46 = vmul.f32 -1.442695, %v2018_v62  ;;  %v2170_v58 = vadd.f32 1.0, %v3030_v25 }
 0x215   : > { %v2021_v52 = vpop.f32.mrf.mxu1  ;;  %v4053_v1 = vpop.eup %3033  ;;  %3059 = vpow2.f32 %v2634_v38  ;;  %v1919_v14 = vadd.f32 %v1918_v51, %v1451_v0 }
 0x216   : > { %v1920_v47 = vpop.f32.mrf.mxu0  ;;  %v4055_v21 = vpop.eup %3035  ;;  %3061 = vrcp.f32 %v2168_v2  ;;  %v2637_v9 = vmul.f32 -1.442695, %v2020_v44  ;;  %v2022_v10 = vadd.f32 %v2021_v52, %v1909_v45 }
 0x217   : > { %v2023_v39 = vpop.f32.mrf.mxu1  ;;  %v3038_v61 = vpop.eup %3037  ;;  %3063 = vpow2.f32 %v2635_v48  ;;  %v1921_v29 = vadd.f32 %v1920_v47, %v1451_v0 }
 0x218   : > { %v1924_v63 = vpop.f32.mrf.mxu0  ;;  %v4058_v8 = vpop.eup %3039  ;;  %3065 = vrcp.f32 %v2169_v59  ;;  %v2171_v13 = vadd.f32 1.0, %v3038_v61  ;;  %v2638_v24 = vmul.f32 -1.442695, %v2022_v10  ;;  %v2024_v57 = vadd.f32 %v2023_v39, %v1911_v18 }
 0x219   : > { %v2027_v4 = vpop.f32.mrf.mxu1  ;;  %v4060_v12 = vpop.eup %3041  ;;  %3067 = vpow2.f32 %v2636_v46  ;;  %v1925_v27 = vadd.f32 %v1924_v63, %v1456_v43  ;;  %v2117_v39 = vadd.f32 1.0, %v4049_v42  ;;  %v2262_v63 = vld [vmem:[%s4072_s11] sm:$0xff] }
 0x21a   : > { %v2028_v6 = vadd.f32 %v2027_v4, %v1915_v3  ;;  %v1926_v11 = vpop.f32.mrf.mxu0  ;;  %v4062_v17 = vpop.eup %3043  ;;  %3069 = vrcp.f32 %v2170_v58  ;;  %v2639_v60 = vmul.f32 -1.442695, %v2024_v57  ;;  %v2263_v58 = vld [vmem:[%s4072_s11 + $0x8] sm:$0xff] }
 0x21b   : > { %v2029_v7 = vpop.f32.mrf.mxu1  ;;  %v3046_v19 = vpop.eup %3045  ;;  %v1927_v53 = vadd.f32 %v1926_v11, %v1456_v43 }
 0x21c   : > { %v2030_v15 = vadd.f32 %v2029_v7, %v1917_v5  ;;  %3071 = vtanh.f32 %v2028_v6  ;;  %v4065_v40 = vpop.eup %3047  ;;  %v1928_v20 = vpop.f32.mrf.mxu0  ;;  %v2172_v23 = vadd.f32 1.0, %v3046_v19  ;;  %v2264_v7 = vld [vmem:[%s4072_s11 + $0x10] sm:$0xff] }
 0x21d   : > { %v2031_v16 = vpop.f32.mrf.mxu1  ;;  %3073 = vpow2.f32 %v2637_v9  ;;  %v3050_v26 = vpop.eup %3049 }
 0x21e   : > { %v2032_v35 = vadd.f32 %v2031_v16, %v1919_v14  ;;  %3075 = vtanh.f32 %v2030_v15  ;;  %v3052_v49 = vpop.eup %3051  ;;  %v1461_v50 = vpop.permute.xlu0 %1460  ;;  %v2173_v2 = vadd.f32 1.0, %v3050_v26  ;;  %v2265_v16 = vld [vmem:[%s4072_s11 + $0x18] sm:$0xff] }
 0x21f   : > { %v2033_v30 = vpop.f32.mrf.mxu1  ;;  %3077 = vrcp.f32 %v2171_v13  ;;  %v3054_v41 = vpop.eup %3053  ;;  %v1929_v55 = vadd.f32 %v1928_v20, %v1461_v50  ;;  %v2222_v4 = vadd.f32 1.0, %v3052_v49 }
 0x220   : > { %v2034_v36 = vadd.f32 %v2033_v30, %v1921_v29  ;;  %3079 = vtanh.f32 %v2032_v35  ;;  %v3056_v37 = vpop.eup %3055  ;;  %v1930_v54 = vpop.f32.mrf.mxu0  ;;  %v2270_v45 = vmul.f32 %v3054_v41, %v2262_v63  ;;  %v2266_v35 = vld [vmem:[%s4072_s11 + $0x20] sm:$0xff] }
 0x221   : > { %v2037_v31 = vpop.f32.mrf.mxu1  ;;  %3081 = vpow2.f32 %v2638_v24  ;;  %v3058_v51 = vpop.eup %3057  ;;  %v1931_v22 = vadd.f32 %v1930_v54, %v1461_v50  ;;  %v2223_v6 = vadd.f32 1.0, %v3056_v37  ;;  %v2269_v54 = vld [vmem:[%s4072_s11 + $0x38] sm:$0xff] }
 0x222   : > { %v2038_v34 = vadd.f32 %v2037_v31, %v1925_v27  ;;  %3083 = vtanh.f32 %v2034_v36  ;;  %v3060_v52 = vpop.eup %3059  ;;  %v2271_v10 = vmul.f32 %v3058_v51, %v2263_v58  ;;  %v2267_v27 = vld [vmem:[%s4072_s11 + $0x28] sm:$0xff] }
 0x223   : > { %v2039_v33 = vpop.f32.mrf.mxu1  ;;  %3085 = vrcp.f32 %v2172_v23  ;;  %v3062_v28 = vpop.eup %3061  ;;  %v2224_v15 = vadd.f32 1.0, %v3060_v52 }
 0x224   : > { %v2040_v38 = vadd.f32 %v2039_v33, %v1927_v53  ;;  %3087 = vtanh.f32 %v2038_v34  ;;  %v3064_v48 = vpop.eup %3063  ;;  %v2272_v18 = vmul.f32 %v3062_v28, %v2264_v7  ;;  %v2268_v53 = vld [vmem:[%s4072_s11 + $0x30] sm:$0xff] }
 0x225   : > { %v2041_v62 = vpop.f32.mrf.mxu1  ;;  %3089 = vpow2.f32 %v2639_v60  ;;  %v3066_v59 = vpop.eup %3065 }
 0x226   : > { %v2042_v47 = vadd.f32 %v2041_v62, %v1929_v55  ;;  %3091 = vtanh.f32 %v2040_v38  ;;  %v3068_v44 = vpop.eup %3067  ;;  %v2273_v24 = vmul.f32 %v3066_v59, %v2265_v16 }
 0x227   : > { %v2043_v25 = vpop.f32.mrf.mxu1  ;;  %3093 = vrcp.f32 %v2173_v2  ;;  %v3070_v3 = vpop.eup %3069  ;;  %v2226_v26 = vadd.f32 1.0, %v3068_v44 }
 0x228   : > { %v2044_v32 = vadd.f32 %v2043_v25, %v1931_v22  ;;  %3095 = vtanh.f32 %v2042_v47  ;;  %v2274_v31 = vmul.f32 %v3070_v3, %v2266_v35 }
 0x229   : > { %v3072_v46 = vpop.eup %3071  ;;  %3097 = vrcp.f32 %v2117_v39 }
 0x22a   : > { %v3074_v42 = vpop.eup %3073  ;;  %v2278_v61 = vmul.f32 %v3072_v46, %v4051_v56  ;;  %3099 = vtanh.f32 %v2044_v32 }
 0x22b   : > { %v3076_v5 = vpop.eup %3075  ;;  %3101 = vrcp.f32 %v2222_v4  ;;  %v2227_v41 = vadd.f32 1.0, %v3074_v42 }
 0x22c   : > { %v3078_v0 = vpop.eup %3077  ;;  %v2286_v9 = vadd.f32 %v2278_v61, %v2270_v45  ;;  %v2279_v11 = vmul.f32 %v3076_v5, %v4053_v1  ;;  %v2225_v1 = vadd.f32 1.0, %v3064_v48 }
 0x22d   : > { %v3080_v14 = vpop.eup %3079  ;;  %v2275_v33 = vmul.f32 %v3078_v0, %v2267_v27 }
 0x22e   : > { %v3082_v13 = vpop.eup %3081  ;;  %3103 = vtanh.f32 %v2286_v9  ;;  %2318 = vst [vmem:[%s4087_s10] sm:$0xff] %v2286_v9  ;;  %v2287_v56 = vadd.f32 %v2279_v11, %v2271_v10  ;;  %v2280_v19 = vmul.f32 %v3080_v14, %v4055_v21 }
 0x22f   : > { %v3084_v29 = vpop.eup %3083  ;;  %3105 = vrcp.f32 %v2223_v6  ;;  %v2228_v60 = vadd.f32 1.0, %v3082_v13 }
 0x230   : > { %v3086_v30 = vpop.eup %3085  ;;  %3107 = vtanh.f32 %v2287_v56  ;;  %2319 = vst [vmem:[%s4087_s10 + $0x8] sm:$0xff] %v2287_v56  ;;  %v2288_v43 = vadd.f32 %v2280_v19, %v2272_v18  ;;  %v2281_v57 = vmul.f32 %v3084_v29, %v4058_v8 }
 0x231   : > { %v3088_v20 = vpop.eup %3087  ;;  %3109 = vrcp.f32 %v2224_v15  ;;  %v2276_v55 = vmul.f32 %v3086_v30, %v2268_v53 }
 0x232   : > { %v3090_v36 = vpop.eup %3089  ;;  %3111 = vtanh.f32 %v2288_v43  ;;  %2320 = vst [vmem:[%s4087_s10 + $0x10] sm:$0xff] %v2288_v43  ;;  %v2289_v21 = vadd.f32 %v2281_v57, %v2273_v24  ;;  %v2282_v49 = vmul.f32 %v3088_v20, %v4060_v12 }
 0x233   : > { %v3092_v23 = vpop.eup %3091  ;;  %3113 = vrcp.f32 %v2225_v1  ;;  %v2229_v52 = vadd.f32 1.0, %v3090_v36 }
 0x234   : > { %v3094_v34 = vpop.eup %3093  ;;  %3115 = vtanh.f32 %v2289_v21  ;;  %2321 = vst [vmem:[%s4087_s10 + $0x18] sm:$0xff] %v2289_v21  ;;  %v2290_v8 = vadd.f32 %v2282_v49, %v2274_v31  ;;  %v2283_v37 = vmul.f32 %v3092_v23, %v4062_v17 }
 0x235   : > { %v3096_v50 = vpop.eup %3095  ;;  %3117 = vrcp.f32 %v2226_v26  ;;  %v2277_v2 = vmul.f32 %v3094_v34, %v2269_v54 }
 0x236   : > { %v3098_v12 = vpop.eup %3097  ;;  %3119 = vtanh.f32 %v2290_v8  ;;  %2322 = vst [vmem:[%s4087_s10 + $0x20] sm:$0xff] %v2290_v8  ;;  %v2291_v51 = vadd.f32 %v2283_v37, %v2275_v33  ;;  %v2284_v38 = vmul.f32 %v3096_v50, %v4065_v40 }
 0x237   : > { %v3100_v62 = vpop.eup %3099  ;;  %3121 = vrcp.f32 %v2227_v41 }
 0x238   : > { %3123 = vtanh.f32 %v2291_v51  ;;  %2323 = vst [vmem:[%s4087_s10 + $0x28] sm:$0xff] %v2291_v51  ;;  %v2292_v17 = vadd.f32 %v2284_v38, %v2276_v55  ;;  %v2285_v28 = vmul.f32 %v3100_v62, %v3098_v12  ;;  %v3102_v22 = vpop.eup %3101 }
 0x239   : > { %3125 = vrcp.f32 %v2228_v60 }
 0x23a   : > { %3127 = vtanh.f32 %v2292_v17  ;;  %2324 = vst [vmem:[%s4087_s10 + $0x30] sm:$0xff] %v2292_v17  ;;  %v2293_v47 = vadd.f32 %v2285_v28, %v2277_v2 }
 0x23b   : > { %v3104_v40 = vpop.eup %3103  ;;  %3129 = vrcp.f32 %v2229_v52 }
 0x23c   : > { %v3106_v25 = vpop.eup %3105  ;;  %v2302_v48 = vmul.f32 %v3104_v40, %v3102_v22  ;;  %3131 = vtanh.f32 %v2293_v47  ;;  %2325 = vst [vmem:[%s4087_s10 + $0x38] sm:$0xff] %v2293_v47 }
 0x23d   : > { %v3108_v39 = vpop.eup %3107 }
 0x23e   : > { %3197 = shalt.err (!%p3194_p3)
}
 0x23f   : > { %s3198_s11 = scalar_lea.hbm %s4112_s17, 1024  ;;  %s3202_s16 = scalar_lea.hbm %s4201_s6, 2048 }
 0x240   : > { %p3199_p4 = scmp.ne.s32.totalorder %s4112_s17, %s3198_s11  ;;  %p3203_p9 = scmp.lt.s32.totalorder %s4112_s17, %s4201_s6 }
 0x241   : > { %p3204_p10 = scmp.lt.s32.totalorder %s3202_s16, %s3198_s11 }
 0x242   : > { %p3200_p7 = pnand %p3199_p4, %p3363_p5 }
 0x243   : > { %p3205_p11 = por %p3204_p10, %p3203_p9 }
 0x244   : > { %p3201_p8 = pneg %p3200_p7 }
 0x246   : > { %p3206_p12 = pnand %p3205_p11, %p3201_p8 }
 0x248   : > { %3209 = shalt.err (!%p3206_p12)
}
 0x249   : > { %s3288_s19 = smov 256   ;;  %v3110_v59 = vpop.eup %3109  ;;  %s278_s13 = scalar_lea.vmem [#allocation5], %s2483_s9  ;;  %v2303_v32 = vmul.f32 %v3108_v39, %v3106_v25 }
 0x24a   : > { %2704 = dma.vmem_to_hbm [thread:$0]  (%p3363_p5), %s4114_s14, 1024, %s4112_s17, %s2332_s18, %s3288_s19, %s3288_s19, %s3279_s20   ;;  %v3112_v44 = vpop.eup %3111 }
 0x24b   : > { %2310 = vst [vmem:[%s278_s13] sm:$0xff] %v2302_v48  ;;  %v3114_v63 = vpop.eup %3113  ;;  %2311 = vst [vmem:[%s278_s13 + $0x8] sm:$0xff] %v2303_v32  ;;  %v2304_v3 = vmul.f32 %v3112_v44, %v3110_v59  ;;  %s2345_s9 = sshll.u32 %s278_s13, 4  ;;  %s4223_s14 = sshll.u32 %s3346_s25, 10  ;;  %s4152_s9 = int_to_ptr.vmem [resolvable:$true] %s2345_s9 }
 0x24c   : > { %v3116_v46 = vpop.eup %3115  ;;  %s4150_s28 = scalar_lea.hbm %s4200_s5, %s4223_s14  ;;  %s2327_s29 = scalar_lea.sflag [#allocation6], %s4076_s12 }
 0x24d   : > { %v3118_v4 = vpop.eup %3117  ;;  %2312 = vst [vmem:[%s278_s13 + $0x10] sm:$0xff] %v2304_v3  ;;  %v2305_v58 = vmul.f32 %v3116_v46, %v3114_v63  ;;  %s3210_s11 = scalar_lea.vmem %s4152_s9, 1024  ;;  %s3289_s10 = smov [#allocation5]  }
 0x24e   : > { %v3120_v42 = vpop.eup %3119  ;;  %p3211_p13 = scmp.ne.s32.totalorder %s4152_s9, %s3210_s11  ;;  %s3214_s15 = sshll.u32 %s3289_s10, 4  ;;  %s3215_s15 = int_to_ptr.vmem [resolvable:$false] %s3214_s15 }
 0x24f   : > { %v3122_v45 = vpop.eup %3121  ;;  %2313 = vst [vmem:[%s278_s13 + $0x18] sm:$0xff] %v2305_v58  ;;  %v2306_v61 = vmul.f32 %v3120_v42, %v3118_v4  ;;  %s3216_s25 = scalar_lea.vmem %s3215_s15, 2048  ;;  %p3217_p2 = scmp.lt.s32.totalorder %s4152_s9, %s3215_s15 }
 0x250   : > { %v3124_v5 = vpop.eup %3123  ;;  %p3212_p0 = pnand %p3211_p13, %p3363_p5  ;;  %p3218_p3 = scmp.lt.s32.totalorder %s3216_s25, %s3210_s11 }
 0x251   : > { %v3126_v6 = vpop.eup %3125  ;;  %2314 = vst [vmem:[%s278_s13 + $0x20] sm:$0xff] %v2306_v61  ;;  %v2307_v7 = vmul.f32 %v3124_v5, %v3122_v45 }
 0x252   : > { %v3128_v0 = vpop.eup %3127  ;;  %p3213_p1 = pneg %p3212_p0  ;;  %p3219_p4 = por %p3218_p3, %p3217_p2 }
 0x253   : > { %v3130_v9 = vpop.eup %3129  ;;  %2315 = vst [vmem:[%s278_s13 + $0x28] sm:$0xff] %v2307_v7  ;;  %v2308_v10 = vmul.f32 %v3128_v0, %v3126_v6 }
 0x254   : > { %v3132_v11 = vpop.eup %3131  ;;  %p3220_p7 = pnand %p3219_p4, %p3213_p1 }
 0x255   : > { %2316 = vst [vmem:[%s278_s13 + $0x30] sm:$0xff] %v2308_v10  ;;  %v2309_v14 = vmul.f32 %v3132_v11, %v3130_v9 }
 0x257   : > { %2317 = vst [vmem:[%s278_s13 + $0x38] sm:$0xff] %v2309_v14 }
 0x258   : > { %3223 = shalt.err (!%p3220_p7)
}
 0x259   : > { %s3224_s16 = scalar_lea.hbm %s4150_s28, 1024  ;;  %s3228_s13 = scalar_lea.hbm %s4200_s5, 2048 }
 0x25a   : > { %p3225_p8 = scmp.ne.s32.totalorder %s4150_s28, %s3224_s16  ;;  %p3229_p11 = scmp.lt.s32.totalorder %s4150_s28, %s4200_s5 }
 0x25b   : > { %p3230_p12 = scmp.lt.s32.totalorder %s3228_s13, %s3224_s16 }
 0x25c   : > { %p3226_p9 = pnand %p3225_p8, %p3363_p5 }
 0x25d   : > { %p3231_p13 = por %p3230_p12, %p3229_p11 }
 0x25e   : > { %p3227_p10 = pneg %p3226_p9 }
 0x260   : > { %p3232_p0 = pnand %p3231_p13, %p3227_p10 }
 0x262   : > { %3235 = shalt.err (!%p3232_p0)
}
 0x263   : > { %2703 = dma.vmem_to_hbm [thread:$0]  (%p3363_p5), %s4152_s9, 1024, %s4150_s28, %s2327_s29, %s3288_s19, %s3288_s19, %s3279_s20  }
 0x264 PF: > { %p2714_p1 = scmp.ge.s32.totalorder %s3274_s24, 2  ;;  %s2376_s18 = sand.u32 1, %s3262_s21  }
 0x265   : > { %s2377_s11 = scalar_lea.sflag [#allocation6], %s2376_s18 }
 0x266   : > { %p2708_p2 = pnand %p2714_p1, %p3367_p6 }
 0x268   : > { %p2709_p3 = pneg %p2708_p2 }
 0x26a   : > { %3253 = dma.done.wait (%p2709_p3), %s2377_s11, 1024  }
 0x26b   : > { %3255 = vsyncadd (%p2709_p3), %s2377_s11, 4294966272  ;;  %s2386_s10 = scalar_lea.sflag [#allocation8], %s2376_s18 }
 0x26c   : > { %3257 = dma.done.wait (%p2709_p3), %s2386_s10, 1024  }
 0x26d   : > { %3259 = vsyncadd (%p2709_p3), %s2386_s10, 4294966272  ;;  %p20_p5 = scmp.ge.s32.totalorder %s3350_s27, 4   ;;  %s4224_s21 = smov %s3266_s22 }
 0x26e   : > { %s4225_s22 = smov %s3270_s23  ;;  %s4226_s23 = smov %s3361_s30 }
 0x26f   : > { %s4227_s24 = smov %s3350_s27  ;;  %22 = sbr.rel (!%p20_p5) target bundleno = 5 (0x5), region = 98 }
 0x274   :  { %2391 = vsyncpa [#allocation6], 1 }
 0x275   :  { %2393 = vsyncpa [#allocation6 + $0x1], 1 }
 0x276   :  { %2394 = vsyncpa [#allocation8], 1 }
 0x277   :  { %2396 = vsyncpa [#allocation8 + $0x1], 1 }

</bundles_post_ra>
